<compile_context>
chip_gen: v6e
topology: v6e:2x2x1
jax: 0.10.0
libtpu: 0.0.40
codegen_flags: <defaults>
</compile_context>

<pallas_src>
import jax
import jax.numpy as jnp
from jax.experimental import pallas as pl
from jax.experimental.pallas import tpu as pltpu


def _round_up(x, m):
    return (x + m - 1) // m * m


def _ae_fused_kernel(x_ref, w_ref, b_ref, out_ref):
    """Fused 8-layer MLP forward on one batch tile.

    x_ref:   (TN, P)      zero-padded input tile
    w_ref:   (8, P, P)    zero-padded weight stack (resident across grid)
    b_ref:   (8, P)       zero-padded bias stack   (resident across grid)
    out_ref: (TN, 5*P)    packed lane-dense outputs:
             [x_bar | enc_z2 | enc_z3 | enc_z4 | z], each padded to P lanes.
    """
    p = x_ref.shape[1]

    def layer(h, k, relu):
        y = jnp.dot(h, w_ref[k], preferred_element_type=jnp.float32)
        y = y + b_ref[k:k + 1, :]          # (1, P) broadcasts over batch tile
        if relu:
            y = jnp.maximum(y, 0.0)
        return y

    h = x_ref[...].astype(jnp.float32)
    e2 = layer(h, 0, relu=True)
    e3 = layer(e2, 1, relu=True)
    e4 = layer(e3, 2, relu=True)
    z = layer(e4, 3, relu=False)
    d2 = layer(z, 4, relu=True)
    d3 = layer(d2, 5, relu=True)
    d4 = layer(d3, 6, relu=True)
    xb = layer(d4, 7, relu=False)

    dt = out_ref.dtype
    out_ref[:, 0 * p:1 * p] = xb.astype(dt)
    out_ref[:, 1 * p:2 * p] = e2.astype(dt)
    out_ref[:, 2 * p:3 * p] = e3.astype(dt)
    out_ref[:, 3 * p:4 * p] = e4.astype(dt)
    out_ref[:, 4 * p:5 * p] = z.astype(dt)


def ae_forward(x, params, *, batch_tile=256):
    """Fused AE forward pass as a single Pallas TPU kernel.

    params: list of 8 (W, b) tuples in layer order
            [enc_1, enc_2, enc_3, z_layer, dec_1, dec_2, dec_3, x_bar_layer],
            with W of shape (in, out) and b of shape (1, out).
    Returns (x_bar, enc_z2, enc_z3, enc_z4, z), matching the PyTorch module.
    """
    n, n_input = x.shape
    out_dims = [w.shape[1] for w, _ in params]
    n_enc_1, n_enc_2, n_enc_3, n_z = out_dims[0], out_dims[1], out_dims[2], out_dims[3]
    assert params[7][0].shape[1] == n_input
    dtype = x.dtype

    # One common lane-padded feature width (multiple of 128).
    p = _round_up(max([n_input] + out_dims), 128)

    # Batch tiling: sublane-aligned tile, 1-D "parallel" grid over batch.
    tn = _round_up(min(batch_tile, _round_up(n, 8)), 8)
    n_pad = _round_up(n, tn)
    grid = (n_pad // tn,)

    # Pack the 16 tiny parameter tensors into two contiguous zero-padded slabs.
    w_slab = jnp.zeros((8, p, p), dtype)
    b_slab = jnp.zeros((8, p), dtype)
    for k, (w, b) in enumerate(params):
        w_slab = w_slab.at[k, :w.shape[0], :w.shape[1]].set(w.astype(dtype))
        b_slab = b_slab.at[k, :b.shape[-1]].set(b.reshape(-1).astype(dtype))

    # Zero-pad the input (batch to tile multiple, features to P lanes).
    x_pad = jnp.zeros((n_pad, p), dtype).at[:n, :n_input].set(x)

    # Advisory cost estimate so XLA schedules around the custom call.
    itemsize = jnp.dtype(dtype).itemsize
    flops = 2 * n * sum(w.shape[0] * w.shape[1] for w, _ in params)
    bytes_accessed = itemsize * (
        n * n_input
        + sum(w.size + b.size for w, b in params)
        + n * sum(out_dims[:4] + [n_input])
    )

    packed = pl.pallas_call(
        _ae_fused_kernel,
        out_shape=jax.ShapeDtypeStruct((n_pad, 5 * p), dtype),
        grid=grid,
        in_specs=[
            pl.BlockSpec((tn, p), lambda i: (i, 0)),        # activations: tiled
            pl.BlockSpec((8, p, p), lambda i: (0, 0, 0)),   # weights: resident
            pl.BlockSpec((8, p), lambda i: (0, 0)),         # biases: resident
        ],
        out_specs=pl.BlockSpec((tn, 5 * p), lambda i: (i, 0)),
        compiler_params=pltpu.CompilerParams(
            dimension_semantics=("parallel",),
        ),
        cost_estimate=pl.CostEstimate(
            flops=flops, transcendentals=0, bytes_accessed=bytes_accessed),
    )(x_pad, w_slab, b_slab)

    # Unpack the lane-dense slab and trim padding.
    x_bar = packed[:n, 0 * p:0 * p + n_input]
    enc_z2 = packed[:n, 1 * p:1 * p + n_enc_1]
    enc_z3 = packed[:n, 2 * p:2 * p + n_enc_2]
    enc_z4 = packed[:n, 3 * p:3 * p + n_enc_3]
    z = packed[:n, 4 * p:4 * p + n_z]
    return x_bar, enc_z2, enc_z3, enc_z4, z


def init_params(key, n_enc_1, n_enc_2, n_enc_3, n_dec_1, n_dec_2, n_dec_3,
                n_input, n_z, dtype=jnp.float32):
    """Deterministic synthetic parameter init (Kaiming-uniform-ish)."""
    dims = [
        (n_input, n_enc_1), (n_enc_1, n_enc_2), (n_enc_2, n_enc_3),
        (n_enc_3, n_z),
        (n_z, n_dec_1), (n_dec_1, n_dec_2), (n_dec_2, n_dec_3),
        (n_dec_3, n_input),
    ]
    params = []
    for (fan_in, fan_out) in dims:
        key, kw, kb = jax.random.split(key, 3)
        bound = 1.0 / jnp.sqrt(fan_in)
        w = jax.random.uniform(kw, (fan_in, fan_out), dtype, -bound, bound)
        b = jax.random.uniform(kb, (1, fan_out), dtype, -bound, bound)
        params.append((w, b))
    return params


def ae_forward_ref(x, params):
    """Pure-JAX reference for correctness checking."""
    def lin(h, pr, relu):
        y = h @ pr[0] + pr[1]
        return jnp.maximum(y, 0.0) if relu else y
    e2 = lin(x, params[0], True)
    e3 = lin(e2, params[1], True)
    e4 = lin(e3, params[2], True)
    z = lin(e4, params[3], False)
    d2 = lin(z, params[4], True)
    d3 = lin(d2, params[5], True)
    d4 = lin(d3, params[6], True)
    xb = lin(d4, params[7], False)
    return xb, e2, e3, e4, z


if __name__ == "__main__":
    # Small feature dims consistent with the AE module; batch large enough to
    # exercise the 1-D parallel grid (2 batch tiles of 256 rows).
    batch = 512
    n_input = 32
    n_enc_1, n_enc_2, n_enc_3 = 64, 48, 32
    n_dec_1, n_dec_2, n_dec_3 = 32, 48, 64
    n_z = 16

    key = jax.random.PRNGKey(0)
    key, kx = jax.random.split(key)
    x = jax.random.normal(kx, (batch, n_input), jnp.float32)

    params = init_params(key, n_enc_1, n_enc_2, n_enc_3,
                         n_dec_1, n_dec_2, n_dec_3, n_input, n_z)

    outs = ae_forward(x, params, batch_tile=256)
    outs = jax.block_until_ready(outs)

    refs = ae_forward_ref(x, params)
    for o, r in zip(outs, refs):
        assert o.shape == r.shape and o.dtype == r.dtype
        err = float(jnp.max(jnp.abs(o - r)))
        assert jnp.allclose(o, r, atol=5e-5, rtol=5e-5), f"max abs err {err}"

    print("KERNEL_OK")
</pallas_src>

<mosaic_0001>
module attributes {stable_mosaic.version = 11 : i64} {
  func.func @_ae_fused_kernel(%arg0: i32, %arg1: memref<256x128xf32, #tpu.memory_space<vmem>>, %arg2: memref<8x128x128xf32, #tpu.memory_space<vmem>>, %arg3: memref<8x128xf32, #tpu.memory_space<vmem>>, %arg4: memref<256x640xf32, #tpu.memory_space<vmem>>) attributes {dimension_semantics = [#tpu.dimension_semantics<parallel>], iteration_bounds = array<i64: 2>, scalar_prefetch = 0 : i64, scratch_operands = 0 : i64, tpu.core_type = #tpu.core_type<tc>, window_params = [{transform_indices = @transform_0, window_bounds = array<i64: 256, 128>}, {pipeline_mode = #tpu.pipeline_mode<synchronous>, transform_indices = @transform_1, window_bounds = array<i64: 8, 128, 128>}, {pipeline_mode = #tpu.pipeline_mode<synchronous>, transform_indices = @transform_2, window_bounds = array<i64: 8, 128>}, {transform_indices = @transform_3, window_bounds = array<i64: 256, 640>}]} {
    %c0 = arith.constant 0 : index
    %c0_0 = arith.constant 0 : index
    %0 = vector.load %arg1[%c0, %c0_0] : memref<256x128xf32, #tpu.memory_space<vmem>>, vector<256x128xf32>
    %c0_1 = arith.constant 0 : index
    %c0_2 = arith.constant 0 : index
    %c0_3 = arith.constant 0 : index
    %1 = vector.load %arg2[%c0_1, %c0_2, %c0_3] : memref<8x128x128xf32, #tpu.memory_space<vmem>>, vector<1x128x128xf32>
    %2 = vector.shape_cast %1 : vector<1x128x128xf32> to vector<128x128xf32>
    %cst = arith.constant dense<0.000000e+00> : vector<256x128xf32>
    %3 = tpu.matmul %0, %2, %cst {dimension_numbers = #tpu.dot_dimension_numbers<[1], [0], [0], [1], [0, 0, 1, 1], [], []>} : vector<256x128xf32>, vector<128x128xf32>, vector<256x128xf32> -> vector<256x128xf32>
    %c0_4 = arith.constant 0 : index
    %c0_5 = arith.constant 0 : index
    %4 = vector.load %arg3[%c0_4, %c0_5] : memref<8x128xf32, #tpu.memory_space<vmem>>, vector<1x128xf32>
    %5 = vector.broadcast %4 : vector<1x128xf32> to vector<256x128xf32>
    %6 = arith.addf %3, %5 : vector<256x128xf32>
    %cst_6 = arith.constant 0.000000e+00 : f32
    %7 = vector.broadcast %cst_6 : f32 to vector<256x128xf32>
    %8 = arith.maximumf %6, %7 : vector<256x128xf32>
    %c1 = arith.constant 1 : index
    %c0_7 = arith.constant 0 : index
    %c0_8 = arith.constant 0 : index
    %9 = vector.load %arg2[%c1, %c0_7, %c0_8] : memref<8x128x128xf32, #tpu.memory_space<vmem>>, vector<1x128x128xf32>
    %10 = vector.shape_cast %9 : vector<1x128x128xf32> to vector<128x128xf32>
    %cst_9 = arith.constant dense<0.000000e+00> : vector<256x128xf32>
    %11 = tpu.matmul %8, %10, %cst_9 {dimension_numbers = #tpu.dot_dimension_numbers<[1], [0], [0], [1], [0, 0, 1, 1], [], []>} : vector<256x128xf32>, vector<128x128xf32>, vector<256x128xf32> -> vector<256x128xf32>
    %c1_10 = arith.constant 1 : index
    %c0_11 = arith.constant 0 : index
    %12 = vector.load %arg3[%c1_10, %c0_11] : memref<8x128xf32, #tpu.memory_space<vmem>>, vector<1x128xf32>
    %13 = vector.broadcast %12 : vector<1x128xf32> to vector<256x128xf32>
    %14 = arith.addf %11, %13 : vector<256x128xf32>
    %cst_12 = arith.constant 0.000000e+00 : f32
    %15 = vector.broadcast %cst_12 : f32 to vector<256x128xf32>
    %16 = arith.maximumf %14, %15 : vector<256x128xf32>
    %c2 = arith.constant 2 : index
    %c0_13 = arith.constant 0 : index
    %c0_14 = arith.constant 0 : index
    %17 = vector.load %arg2[%c2, %c0_13, %c0_14] : memref<8x128x128xf32, #tpu.memory_space<vmem>>, vector<1x128x128xf32>
    %18 = vector.shape_cast %17 : vector<1x128x128xf32> to vector<128x128xf32>
    %cst_15 = arith.constant dense<0.000000e+00> : vector<256x128xf32>
    %19 = tpu.matmul %16, %18, %cst_15 {dimension_numbers = #tpu.dot_dimension_numbers<[1], [0], [0], [1], [0, 0, 1, 1], [], []>} : vector<256x128xf32>, vector<128x128xf32>, vector<256x128xf32> -> vector<256x128xf32>
    %c2_16 = arith.constant 2 : index
    %c0_17 = arith.constant 0 : index
    %20 = vector.load %arg3[%c2_16, %c0_17] : memref<8x128xf32, #tpu.memory_space<vmem>>, vector<1x128xf32>
    %21 = vector.broadcast %20 : vector<1x128xf32> to vector<256x128xf32>
    %22 = arith.addf %19, %21 : vector<256x128xf32>
    %cst_18 = arith.constant 0.000000e+00 : f32
    %23 = vector.broadcast %cst_18 : f32 to vector<256x128xf32>
    %24 = arith.maximumf %22, %23 : vector<256x128xf32>
    %c3 = arith.constant 3 : index
    %c0_19 = arith.constant 0 : index
    %c0_20 = arith.constant 0 : index
    %25 = vector.load %arg2[%c3, %c0_19, %c0_20] : memref<8x128x128xf32, #tpu.memory_space<vmem>>, vector<1x128x128xf32>
    %26 = vector.shape_cast %25 : vector<1x128x128xf32> to vector<128x128xf32>
    %cst_21 = arith.constant dense<0.000000e+00> : vector<256x128xf32>
    %27 = tpu.matmul %24, %26, %cst_21 {dimension_numbers = #tpu.dot_dimension_numbers<[1], [0], [0], [1], [0, 0, 1, 1], [], []>} : vector<256x128xf32>, vector<128x128xf32>, vector<256x128xf32> -> vector<256x128xf32>
    %c3_22 = arith.constant 3 : index
    %c0_23 = arith.constant 0 : index
    %28 = vector.load %arg3[%c3_22, %c0_23] : memref<8x128xf32, #tpu.memory_space<vmem>>, vector<1x128xf32>
    %29 = vector.broadcast %28 : vector<1x128xf32> to vector<256x128xf32>
    %30 = arith.addf %27, %29 : vector<256x128xf32>
    %c4 = arith.constant 4 : index
    %c0_24 = arith.constant 0 : index
    %c0_25 = arith.constant 0 : index
    %31 = vector.load %arg2[%c4, %c0_24, %c0_25] : memref<8x128x128xf32, #tpu.memory_space<vmem>>, vector<1x128x128xf32>
    %32 = vector.shape_cast %31 : vector<1x128x128xf32> to vector<128x128xf32>
    %cst_26 = arith.constant dense<0.000000e+00> : vector<256x128xf32>
    %33 = tpu.matmul %30, %32, %cst_26 {dimension_numbers = #tpu.dot_dimension_numbers<[1], [0], [0], [1], [0, 0, 1, 1], [], []>} : vector<256x128xf32>, vector<128x128xf32>, vector<256x128xf32> -> vector<256x128xf32>
    %c4_27 = arith.constant 4 : index
    %c0_28 = arith.constant 0 : index
    %34 = vector.load %arg3[%c4_27, %c0_28] : memref<8x128xf32, #tpu.memory_space<vmem>>, vector<1x128xf32>
    %35 = vector.broadcast %34 : vector<1x128xf32> to vector<256x128xf32>
    %36 = arith.addf %33, %35 : vector<256x128xf32>
    %cst_29 = arith.constant 0.000000e+00 : f32
    %37 = vector.broadcast %cst_29 : f32 to vector<256x128xf32>
    %38 = arith.maximumf %36, %37 : vector<256x128xf32>
    %c5 = arith.constant 5 : index
    %c0_30 = arith.constant 0 : index
    %c0_31 = arith.constant 0 : index
    %39 = vector.load %arg2[%c5, %c0_30, %c0_31] : memref<8x128x128xf32, #tpu.memory_space<vmem>>, vector<1x128x128xf32>
    %40 = vector.shape_cast %39 : vector<1x128x128xf32> to vector<128x128xf32>
    %cst_32 = arith.constant dense<0.000000e+00> : vector<256x128xf32>
    %41 = tpu.matmul %38, %40, %cst_32 {dimension_numbers = #tpu.dot_dimension_numbers<[1], [0], [0], [1], [0, 0, 1, 1], [], []>} : vector<256x128xf32>, vector<128x128xf32>, vector<256x128xf32> -> vector<256x128xf32>
    %c5_33 = arith.constant 5 : index
    %c0_34 = arith.constant 0 : index
    %42 = vector.load %arg3[%c5_33, %c0_34] : memref<8x128xf32, #tpu.memory_space<vmem>>, vector<1x128xf32>
    %43 = vector.broadcast %42 : vector<1x128xf32> to vector<256x128xf32>
    %44 = arith.addf %41, %43 : vector<256x128xf32>
    %cst_35 = arith.constant 0.000000e+00 : f32
    %45 = vector.broadcast %cst_35 : f32 to vector<256x128xf32>
    %46 = arith.maximumf %44, %45 : vector<256x128xf32>
    %c6 = arith.constant 6 : index
    %c0_36 = arith.constant 0 : index
    %c0_37 = arith.constant 0 : index
    %47 = vector.load %arg2[%c6, %c0_36, %c0_37] : memref<8x128x128xf32, #tpu.memory_space<vmem>>, vector<1x128x128xf32>
    %48 = vector.shape_cast %47 : vector<1x128x128xf32> to vector<128x128xf32>
    %cst_38 = arith.constant dense<0.000000e+00> : vector<256x128xf32>
    %49 = tpu.matmul %46, %48, %cst_38 {dimension_numbers = #tpu.dot_dimension_numbers<[1], [0], [0], [1], [0, 0, 1, 1], [], []>} : vector<256x128xf32>, vector<128x128xf32>, vector<256x128xf32> -> vector<256x128xf32>
    %c6_39 = arith.constant 6 : index
    %c0_40 = arith.constant 0 : index
    %50 = vector.load %arg3[%c6_39, %c0_40] : memref<8x128xf32, #tpu.memory_space<vmem>>, vector<1x128xf32>
    %51 = vector.broadcast %50 : vector<1x128xf32> to vector<256x128xf32>
    %52 = arith.addf %49, %51 : vector<256x128xf32>
    %cst_41 = arith.constant 0.000000e+00 : f32
    %53 = vector.broadcast %cst_41 : f32 to vector<256x128xf32>
    %54 = arith.maximumf %52, %53 : vector<256x128xf32>
    %c7 = arith.constant 7 : index
    %c0_42 = arith.constant 0 : index
    %c0_43 = arith.constant 0 : index
    %55 = vector.load %arg2[%c7, %c0_42, %c0_43] : memref<8x128x128xf32, #tpu.memory_space<vmem>>, vector<1x128x128xf32>
    %56 = vector.shape_cast %55 : vector<1x128x128xf32> to vector<128x128xf32>
    %cst_44 = arith.constant dense<0.000000e+00> : vector<256x128xf32>
    %57 = tpu.matmul %54, %56, %cst_44 {dimension_numbers = #tpu.dot_dimension_numbers<[1], [0], [0], [1], [0, 0, 1, 1], [], []>} : vector<256x128xf32>, vector<128x128xf32>, vector<256x128xf32> -> vector<256x128xf32>
    %c7_45 = arith.constant 7 : index
    %c0_46 = arith.constant 0 : index
    %58 = vector.load %arg3[%c7_45, %c0_46] : memref<8x128xf32, #tpu.memory_space<vmem>>, vector<1x128xf32>
    %59 = vector.broadcast %58 : vector<1x128xf32> to vector<256x128xf32>
    %60 = arith.addf %57, %59 : vector<256x128xf32>
    %c0_47 = arith.constant 0 : index
    %c0_48 = arith.constant 0 : index
    %61 = vector.load %arg4[%c0_47, %c0_48] : memref<256x640xf32, #tpu.memory_space<vmem>>, vector<256x128xf32>
    tpu.vector_store %arg4[%c0_47, %c0_48], %60 {strides = array<i32>} : memref<256x640xf32, #tpu.memory_space<vmem>>, vector<256x128xf32>,
    %c0_49 = arith.constant 0 : index
    %c128 = arith.constant 128 : index
    %62 = vector.load %arg4[%c0_49, %c128] : memref<256x640xf32, #tpu.memory_space<vmem>>, vector<256x128xf32>
    tpu.vector_store %arg4[%c0_49, %c128], %8 {strides = array<i32>} : memref<256x640xf32, #tpu.memory_space<vmem>>, vector<256x128xf32>,
    %c0_50 = arith.constant 0 : index
    %c256 = arith.constant 256 : index
    %63 = vector.load %arg4[%c0_50, %c256] : memref<256x640xf32, #tpu.memory_space<vmem>>, vector<256x128xf32>
    tpu.vector_store %arg4[%c0_50, %c256], %16 {strides = array<i32>} : memref<256x640xf32, #tpu.memory_space<vmem>>, vector<256x128xf32>,
    %c0_51 = arith.constant 0 : index
    %c384 = arith.constant 384 : index
    %64 = vector.load %arg4[%c0_51, %c384] : memref<256x640xf32, #tpu.memory_space<vmem>>, vector<256x128xf32>
    tpu.vector_store %arg4[%c0_51, %c384], %24 {strides = array<i32>} : memref<256x640xf32, #tpu.memory_space<vmem>>, vector<256x128xf32>,
    %c0_52 = arith.constant 0 : index
    %c512 = arith.constant 512 : index
    %65 = vector.load %arg4[%c0_52, %c512] : memref<256x640xf32, #tpu.memory_space<vmem>>, vector<256x128xf32>
    tpu.vector_store %arg4[%c0_52, %c512], %30 {strides = array<i32>} : memref<256x640xf32, #tpu.memory_space<vmem>>, vector<256x128xf32>,
    return
  }
  func.func @transform_0(%arg0: i32) -> (i32, i32) {
    %c0_i32 = arith.constant 0 : i32
    %c0_i32_0 = arith.constant 0 : i32
    return %arg0, %c0_i32 : i32, i32
  }
  func.func @transform_1(%arg0: i32) -> (i32, i32, i32) {
    %c0_i32 = arith.constant 0 : i32
    %c0_i32_0 = arith.constant 0 : i32
    %c0_i32_1 = arith.constant 0 : i32
    %c0_i32_2 = arith.constant 0 : i32
    return %c0_i32, %c0_i32_0, %c0_i32_1 : i32, i32, i32
  }
  func.func @transform_2(%arg0: i32) -> (i32, i32) {
    %c0_i32 = arith.constant 0 : i32
    %c0_i32_0 = arith.constant 0 : i32
    %c0_i32_1 = arith.constant 0 : i32
    return %c0_i32, %c0_i32_0 : i32, i32
  }
  func.func @transform_3(%arg0: i32) -> (i32, i32) {
    %c0_i32 = arith.constant 0 : i32
    %c0_i32_0 = arith.constant 0 : i32
    return %arg0, %c0_i32 : i32, i32
  }
}

</mosaic_0001>

<bundles_post_ra>
// kernel: tpu_custom_call.1
= control target key start
LH: loop header
LB: loop body
LE: loop exit
PB: predicated region body
PF: predicated region fallthrough
CT: control target
= control target key end

     0   :  { %8 = vsyncpa [#allocation3], 0  ;;  %s4649_s0 = inlined_call_operand.hbm [shape: f32[512,128], index: 0, kind: input, shape index: {}]   ;;  %s4650_s1 = inlined_call_operand.hbm [shape: f32[8,128,128], index: 1, kind: input, shape index: {}]   ;;  %s4651_s2 = inlined_call_operand.hbm [shape: f32[8,128], index: 2, kind: input, shape index: {}]   ;;  %s4652_s3 = inlined_call_operand.hbm [shape: f32[512,640], index: 3, kind: output, shape index: {}]  }
   0x1   :  { %10 = vsyncpa [#allocation3 + $0x1], 0 }
   0x2   :  { %11 = vsyncpa [#allocation6], 0 }
   0x3   :  { %12 = vsyncpa [#allocation4], 0 }
   0x4   :  { %14 = vsyncpa [#allocation4 + $0x1], 0  ;;  %s3985_s12 = smov 0   ;;  %s3987_s13 = smov 0  }
   0x5   :  { %s3989_s14 = smov 0   ;;  %s3991_s15 = smov 0  }
   0x6 LB: > { %s4006_s16 = sadd.s32 4294967295, %s3955_s15   ;;  %s2684_s17 = sadd.s32 4294967294, %s3955_s15   ;;  %s3955_s15 = sphi %s3991_s15, %s4673_s15   ;;  %s3951_s14 = sphi %s3989_s14, %s4672_s14   ;;  %s3947_s13 = sphi %s3987_s13, %s4671_s13   ;;  %s3943_s12 = sphi %s3985_s12, %s4670_s12  }
   0x7   : > { %p40_p0 = scmp.ne.s32.totalorder %s3947_s13, %s3943_s12  ;;  %p4653_p1 = scmp.eq.s32.totalorder %s4006_s16, 0 }
   0x8   : > { %p106_p2 = scmp.eq.s32.totalorder %s4006_s16, 1  ;;  %p112_p3 = scmp.eq.s32.totalorder %s2684_s17, 1 }
   0x9   : > { %p4015_p4 = por %p4653_p1, %p40_p0  ;;  %p2685_p5 = scmp.ge.s32.totalorder %s3955_s15, 1 }
   0xa   : > { %p4020_p6 = por %p112_p3, %p40_p0  ;;  %p119_p7 = scmp.lt.s32.totalorder %s3955_s15, 3 }
   0xb   : > { %s4657_s18 = scalar_select %p4015_p4, 1, 0 }
   0xc   : > { %s4658_s19 = scalar_select %p4020_p6, 1, 0 }
   0xd   : > { %p4025_p8 = pnand %p2685_p5, %p119_p7  ;;  %s3957_s21 = smov [#allocation5]  }
   0xe   : > { %s131_s22 = sshll.u32 %s3957_s21, 4  ;;  %s3958_s24 = smov [#allocation7]   ;;  %s132_s22 = int_to_ptr.vmem [resolvable:$true] %s131_s22 }
   0xf   : > { %s4659_s20 = scalar_select %p4025_p8, 1, 0 }
  0x10   : > { %p3748_p9 = pneg %p4025_p8  ;;  %s145_s25 = sshll.u32 %s3958_s24, 4  ;;  %s146_s25 = int_to_ptr.vmem [resolvable:$true] %s145_s25 }
  0x11   : > { %s3818_s26 = scalar_lea.vmem %s132_s22, 16384  ;;  %p3826_p5 = scmp.lt.s32.totalorder %s132_s22, %s132_s22 }
  0x12   : > { %p4034_p11 = pnand %p3748_p9, %p4653_p1  ;;  %p3819_p13 = scmp.ne.s32.totalorder %s132_s22, %s3818_s26 }
  0x13   : > { %p3827_p7 = scmp.lt.s32.totalorder %s3818_s26, %s3818_s26 }
  0x14   : > { %p3809_p12 = pneg %p4034_p11 }
  0x15   : > { %p3828_p10 = por %p3827_p7, %p3826_p5 }
  0x16   : > { %p3821_p0 = pnand %p3819_p13, %p3809_p12 }
  0x18   : > { %p3822_p3 = pneg %p3821_p0 }
  0x1a   : > { %p3829_p9 = pnand %p3828_p10, %p3822_p3 }
  0x1c   : > { %3832 = shalt.err (!%p3829_p9)
}
  0x1d   : > { %s3959_s27 = smov 128   ;;  %s3960_s28 = smov 8  }
  0x1e   : > { %3751 = dma.hbm_to_vmem [thread:$0]  (!%p4034_p11), %s4650_s1, 16384, %s132_s22, [#allocation6], %s3959_s27, %s3959_s27, %s3960_s28  }
  0x1f   : > { %s3844_s4 = scalar_lea.vmem %s146_s25, 128  ;;  %p3852_p10 = scmp.lt.s32.totalorder %s146_s25, %s146_s25 }
  0x20   : > { %p3845_p13 = scmp.ne.s32.totalorder %s146_s25, %s3844_s4  ;;  %p3853_p3 = scmp.lt.s32.totalorder %s3844_s4, %s3844_s4 }
  0x22   : > { %p3847_p0 = pnand %p3845_p13, %p3809_p12  ;;  %p3854_p7 = por %p3853_p3, %p3852_p10 }
  0x24   : > { %p3848_p5 = pneg %p3847_p0 }
  0x26   : > { %p3855_p9 = pnand %p3854_p7, %p3848_p5 }
  0x28   : > { %3858 = shalt.err (!%p3855_p9)
}
  0x29   : > { %3754 = dma.hbm_to_vmem [thread:$0]  (!%p4034_p11), %s4651_s2, 128, %s146_s25, [#allocation6]  }
  0x2a   : > { %s4060_s7 = sadd.s32 1, %s3955_s15   ;;  %s27_s8 = sadd.s32 1, %s3951_s14 }
  0x2b   : > { %s24_s9 = ssub.s32 %s3955_s15, %s4060_s7  ;;  %p34_p12 = scmp.ne.s32.totalorder %s3951_s14, %s3947_s13 }
  0x2c   : > { %p25_p13 = scmp.eq.s32.totalorder %s24_s9, 0  ;;  %p35_p0 = scmp.eq.s32.totalorder %s3955_s15, 0 }
  0x2d   : > { %p4070_p5 = por %p106_p2, %p34_p12  ;;  %p3765_p10 = scmp.lt.s32.totalorder %s3955_s15, 2 }
  0x2e   : > { %s4076_s11 = scalar_select %p25_p13, %s3951_s14, %s27_s8  }
  0x2f   : > { %s4661_s10 = scalar_select %p4070_p5, 1, 0 }
  0x30   : > { %p36_p3 = por %p35_p0, %p34_p12  ;;  %s156_s17 = sand.u32 1, %s3951_s14  }
  0x31   : > { %s2689_s21 = sshll.u32 %s156_s17, 8  ;;  %s2709_s22 = sshll.u32 %s3955_s15, 12 }
  0x32   : > { %s4083_s25 = scalar_lea.hbm %s4649_s0, %s2709_s22  ;;  %s160_s26 = scalar_lea.vmem [#allocation2], %s2689_s21 }
  0x33   : > { %s167_s29 = sshll.u32 %s160_s26, 4  ;;  %p4087_p2 = pnand %p3765_p10, %p36_p3  ;;  %s4085_s29 = int_to_ptr.vmem [resolvable:$true] %s167_s29 }
  0x34   : > { %s4091_s4 = scalar_lea.sflag [#allocation3], %s156_s17  ;;  %s3859_s5 = scalar_lea.hbm %s4083_s25, 4096 }
  0x35   : > { %p3860_p11 = scmp.ne.s32.totalorder %s4083_s25, %s3859_s5  ;;  %p3861_p7 = pneg %p4087_p2 }
  0x36   : > { %s3864_s9 = scalar_lea.hbm %s4649_s0, 8192  ;;  %p3865_p13 = scmp.lt.s32.totalorder %s4083_s25, %s4649_s0 }
  0x37   : > { %p3862_p9 = pnand %p3861_p7, %p3860_p11  ;;  %p3866_p0 = scmp.lt.s32.totalorder %s3864_s9, %s3859_s5 }
  0x39   : > { %p3863_p12 = pneg %p3862_p9  ;;  %p3867_p10 = por %p3866_p0, %p3865_p13 }
  0x3b   : > { %p3868_p3 = pnand %p3867_p10, %p3863_p12 }
  0x3d   : > { %3871 = shalt.err (!%p3868_p3)
}
  0x3e   : > { %s3872_s17 = scalar_lea.vmem %s4085_s29, 4096  ;;  %s3961_s23 = smov [#allocation2]  }
  0x3f   : > { %p3873_p1 = scmp.ne.s32.totalorder %s4085_s29, %s3872_s17  ;;  %s3877_s24 = sshll.u32 %s3961_s23, 4  ;;  %s3878_s24 = int_to_ptr.vmem [resolvable:$false] %s3877_s24 }
  0x40   : > { %s3879_s26 = scalar_lea.vmem %s3878_s24, 8192  ;;  %p3880_p9 = scmp.lt.s32.totalorder %s4085_s29, %s3878_s24 }
  0x41   : > { %p3875_p6 = pnand %p3873_p1, %p3861_p7  ;;  %p3881_p5 = scmp.lt.s32.totalorder %s3879_s26, %s3872_s17 }
  0x43   : > { %p3876_p11 = pneg %p3875_p6  ;;  %p3882_p4 = por %p3881_p5, %p3880_p9 }
  0x45   : > { %p3883_p8 = pnand %p3882_p4, %p3876_p11 }
  0x47   : > { %3886 = shalt.err (!%p3883_p8)
}
  0x48   : > { %3758 = dma.hbm_to_vmem [thread:$0]  (!%p4087_p2), %s4083_s25, 4096, %s4085_s29, %s4091_s4, %s3959_s27, %s3959_s27, %s3960_s28  }
  0x49   : > { %p4663_p1 = scmp.ne.s32.totalorder %s4659_s20, 0 }
  0x4a   : > { %s4118_s5 = sand.u32 (!%p4663_p1), 1, %s3947_s13   ;;  %p4664_p4 = scmp.ne.s32.totalorder (!%p4663_p1), %s4657_s18, 0 }
  0x4b   : > { %179 = sbr.rel (%p4663_p1) target bundleno = 1786 (0x6fa), region = 32  ;;  %s2693_s6 = sshll.u32 (!%p4663_p1), %s4118_s5, 8 }
  0x4c   : > { %s182_s8 = scalar_lea.sflag (!%p4663_p1), [#allocation3], %s4118_s5  ;;  %s4122_s9 = scalar_lea.vmem (!%p4663_p1), [#allocation2], %s2693_s6 }
  0x50   : > { %3930 = dma.done.wait (%p4664_p4), %s182_s8, 4096  }
  0x51   : > { %3932 = vsyncadd (%p4664_p4), %s182_s8, 4294963200  ;;  %p4665_p6 = scmp.eq.s32.totalorder %s4006_s16, 0 }
  0x53   : > { %3934 = dma.done.wait (%p4665_p6), [#allocation6], 16512   ;;  %p4666_p8 = pmov %p4665_p6 }
  0x54   : > { %v265_v0 = vld [vmem:[#allocation5 + $0x78] sm:$0xff]  ;;  %v264_v1 = vld [vmem:[#allocation5 + $0x70] sm:$0xff]  ;;  %v263_v2 = vld [vmem:[#allocation5 + $0x68] sm:$0xff]  ;;  %s3734_s18 = smul.u32 1280, %s4118_s5  ;;  %p4667_p2 = scmp.ne.s32.totalorder %s4661_s10, 0 }
  0x55   : > { %3936 = vsyncadd (%p4666_p8), [#allocation6], 4294950784  ;;  %3094 = vmatprep.subr.mxu0 %v265_v0  ;;  %v262_v3 = vld [vmem:[#allocation5 + $0x60] sm:$0xff]  ;;  %v261_v5 = vld [vmem:[#allocation5 + $0x58] sm:$0xff]  ;;  %s3735_s27 = smul.u32 20480, %s4006_s16  ;;  %s2578_s16 = scalar_lea.sflag [#allocation4], %s4118_s5 }
  0x56   : > { %3095 = vmatpush3.msra.mxu0 %v265_v0  ;;  %v218_v4 = vld [vmem:[%s4122_s9] sm:$0xff]  ;;  %v260_v6 = vld [vmem:[#allocation5 + $0x50] sm:$0xff]  ;;  %v259_v7 = vld [vmem:[#allocation5 + $0x48] sm:$0xff]  ;;  %s4169_s20 = scalar_lea.vmem [#allocation8], %s3734_s18  ;;  %s3962_s21 = smov [#allocation8]  }
  0x57   : > { %3096 = vmatprep.subr.mxu0 %v264_v1  ;;  %3126 = vmatprep.mubr.f32.mxu0 %v218_v4  ;;  %v258_v8 = vld [vmem:[#allocation5 + $0x40] sm:$0xff]  ;;  %v257_v9 = vld [vmem:[#allocation5 + $0x38] sm:$0xff]  ;;  %v256_v10 = vld [vmem:[#allocation5 + $0x30] sm:$0xff]  ;;  %s2592_s28 = sshll.u32 %s4169_s20, 4  ;;  %s4601_s30 = scalar_lea.hbm %s4652_s3, %s3735_s27  ;;  %s4603_s28 = int_to_ptr.vmem [resolvable:$true] %s2592_s28 }
  0x58   : > { %3097 = vmatpush3.msra.mxu0 %v264_v1  ;;  %v544_v11 = vld [vmem:[#allocation5 + $0xf8] sm:$0xff]  ;;  %v543_v12 = vld [vmem:[#allocation5 + $0xf0] sm:$0xff]  ;;  %v255_v13 = vld [vmem:[#allocation5 + $0x28] sm:$0xff]  ;;  %s3887_s4 = scalar_lea.vmem %s4603_s28, 20480  ;;  %s3891_s22 = sshll.u32 %s3962_s21, 4  ;;  %s3892_s22 = int_to_ptr.vmem [resolvable:$false] %s3891_s22 }
  0x59   : > { %3098 = vmatprep.subr.mxu0 %v263_v2  ;;  %3174 = vmatprep.subr.mxu1 %v544_v11  ;;  %v542_v14 = vld [vmem:[#allocation5 + $0xe8] sm:$0xff]  ;;  %v254_v15 = vld [vmem:[#allocation5 + $0x20] sm:$0xff]  ;;  %v253_v17 = vld [vmem:[#allocation5 + $0x18] sm:$0xff]  ;;  %p3888_p5 = scmp.ne.s32.totalorder %s4603_s28, %s3887_s4  ;;  %s3893_s17 = scalar_lea.vmem %s3892_s22, 40960 }
  0x5a   : > { %3099 = vmatpush3.msra.mxu0 %v263_v2  ;;  %3175 = vmatpush3.msra.mxu1 %v544_v11  ;;  %v541_v16 = vld [vmem:[#allocation5 + $0xe0] sm:$0xff]  ;;  %v540_v18 = vld [vmem:[#allocation5 + $0xd8] sm:$0xff]  ;;  %v252_v19 = vld [vmem:[#allocation5 + $0x10] sm:$0xff]  ;;  %p3894_p13 = scmp.lt.s32.totalorder %s4603_s28, %s3892_s22  ;;  %p3895_p0 = scmp.lt.s32.totalorder %s3893_s17, %s3887_s4 }
  0x5b   : > { %3100 = vmatprep.subr.mxu0 %v262_v3  ;;  %3176 = vmatprep.subr.mxu1 %v543_v12  ;;  %v539_v20 = vld [vmem:[#allocation5 + $0xd0] sm:$0xff]  ;;  %v251_v21 = vld [vmem:[#allocation5 + $0x8] sm:$0xff]  ;;  %v250_v23 = vld [vmem:[#allocation5] sm:$0xff]  ;;  %p3889_p7 = pnand %p3888_p5, %p4667_p2 }
  0x5c   : > { %3101 = vmatpush3.msra.mxu0 %v262_v3  ;;  %3177 = vmatpush3.msra.mxu1 %v543_v12  ;;  %v538_v22 = vld [vmem:[#allocation5 + $0xc8] sm:$0xff]  ;;  %v537_v24 = vld [vmem:[#allocation5 + $0xc0] sm:$0xff]  ;;  %v536_v26 = vld [vmem:[#allocation5 + $0xb8] sm:$0xff]  ;;  %p3896_p10 = por %p3895_p0, %p3894_p13 }
  0x5d   : > { %3102 = vmatprep.subr.mxu0 %v261_v5  ;;  %3178 = vmatprep.subr.mxu1 %v542_v14  ;;  %v219_v25 = vld [vmem:[%s4122_s9 + $0x8] sm:$0xff]  ;;  %v220_v27 = vld [vmem:[%s4122_s9 + $0x10] sm:$0xff]  ;;  %v221_v29 = vld [vmem:[%s4122_s9 + $0x18] sm:$0xff]  ;;  %p3890_p12 = pneg %p3889_p7 }
  0x5e   : > { %3103 = vmatpush3.msra.mxu0 %v261_v5  ;;  %3179 = vmatpush3.msra.mxu1 %v542_v14  ;;  %v535_v28 = vld [vmem:[#allocation5 + $0xb0] sm:$0xff]  ;;  %v534_v30 = vld [vmem:[#allocation5 + $0xa8] sm:$0xff]  ;;  %v222_v31 = vld [vmem:[%s4122_s9 + $0x20] sm:$0xff] }
  0x5f   : > { %3104 = vmatprep.subr.mxu0 %v260_v6  ;;  %3180 = vmatprep.subr.mxu1 %v541_v16  ;;  %v533_v32 = vld [vmem:[#allocation5 + $0xa0] sm:$0xff]  ;;  %v223_v33 = vld [vmem:[%s4122_s9 + $0x28] sm:$0xff]  ;;  %v224_v34 = vld [vmem:[%s4122_s9 + $0x30] sm:$0xff]  ;;  %p3897_p3 = pnand %p3896_p10, %p3890_p12 }
  0x60   : > { %3105 = vmatpush3.msra.mxu0 %v260_v6  ;;  %3181 = vmatpush3.msra.mxu1 %v541_v16  ;;  %v225_v35 = vld [vmem:[%s4122_s9 + $0x38] sm:$0xff]  ;;  %v226_v36 = vld [vmem:[%s4122_s9 + $0x40] sm:$0xff]  ;;  %v227_v37 = vld [vmem:[%s4122_s9 + $0x48] sm:$0xff] }
  0x61   : > { %3106 = vmatprep.subr.mxu0 %v259_v7  ;;  %3182 = vmatprep.subr.mxu1 %v540_v18  ;;  %v228_v38 = vld [vmem:[%s4122_s9 + $0x50] sm:$0xff]  ;;  %v229_v39 = vld [vmem:[%s4122_s9 + $0x58] sm:$0xff]  ;;  %v230_v40 = vld [vmem:[%s4122_s9 + $0x60] sm:$0xff] }
  0x62   : > { %3107 = vmatpush3.msra.mxu0 %v259_v7  ;;  %3183 = vmatpush3.msra.mxu1 %v540_v18  ;;  %v231_v41 = vld [vmem:[%s4122_s9 + $0x68] sm:$0xff]  ;;  %v232_v42 = vld [vmem:[%s4122_s9 + $0x70] sm:$0xff]  ;;  %v233_v43 = vld [vmem:[%s4122_s9 + $0x78] sm:$0xff] }
  0x63   : > { %3108 = vmatprep.subr.mxu0 %v258_v8  ;;  %3184 = vmatprep.subr.mxu1 %v539_v20  ;;  %v234_v44 = vld [vmem:[%s4122_s9 + $0x80] sm:$0xff]  ;;  %v235_v45 = vld [vmem:[%s4122_s9 + $0x88] sm:$0xff]  ;;  %v236_v46 = vld [vmem:[%s4122_s9 + $0x90] sm:$0xff] }
  0x64   : > { %3109 = vmatpush3.msra.mxu0 %v258_v8  ;;  %3185 = vmatpush3.msra.mxu1 %v539_v20  ;;  %v237_v47 = vld [vmem:[%s4122_s9 + $0x98] sm:$0xff]  ;;  %v238_v48 = vld [vmem:[%s4122_s9 + $0xa0] sm:$0xff]  ;;  %v239_v49 = vld [vmem:[%s4122_s9 + $0xa8] sm:$0xff] }
  0x65   : > { %3110 = vmatprep.subr.mxu0 %v257_v9  ;;  %3186 = vmatprep.subr.mxu1 %v538_v22  ;;  %v240_v50 = vld [vmem:[%s4122_s9 + $0xb0] sm:$0xff]  ;;  %v241_v51 = vld [vmem:[%s4122_s9 + $0xb8] sm:$0xff]  ;;  %v242_v52 = vld [vmem:[%s4122_s9 + $0xc0] sm:$0xff] }
  0x66   : > { %3111 = vmatpush3.msra.mxu0 %v257_v9  ;;  %3187 = vmatpush3.msra.mxu1 %v538_v22  ;;  %v243_v53 = vld [vmem:[%s4122_s9 + $0xc8] sm:$0xff]  ;;  %v244_v54 = vld [vmem:[%s4122_s9 + $0xd0] sm:$0xff]  ;;  %v245_v55 = vld [vmem:[%s4122_s9 + $0xd8] sm:$0xff] }
  0x67   : > { %3112 = vmatprep.subr.mxu0 %v256_v10  ;;  %3188 = vmatprep.subr.mxu1 %v537_v24  ;;  %v246_v56 = vld [vmem:[%s4122_s9 + $0xe0] sm:$0xff]  ;;  %v247_v57 = vld [vmem:[%s4122_s9 + $0xe8] sm:$0xff]  ;;  %v248_v58 = vld [vmem:[%s4122_s9 + $0xf0] sm:$0xff] }
  0x68   : > { %3113 = vmatpush3.msra.mxu0 %v256_v10  ;;  %3189 = vmatpush3.msra.mxu1 %v537_v24  ;;  %v249_v59 = vld [vmem:[%s4122_s9 + $0xf8] sm:$0xff]  ;;  %v531_v61 = vld [vmem:[#allocation5 + $0x90] sm:$0xff]  ;;  %v530_v62 = vld [vmem:[#allocation5 + $0x88] sm:$0xff] }
  0x69   : > { %3114 = vmatprep.subr.mxu0 %v255_v13  ;;  %3190 = vmatprep.subr.mxu1 %v536_v26  ;;  %v532_v60 = vld [vmem:[#allocation5 + $0x98] sm:$0xff]  ;;  %v529_v63 = vld [vmem:[#allocation5 + $0x80] sm:$0xff]  ;;  %v822_v1 = vld [vmem:[#allocation5 + $0x170] sm:$0xff] }
  0x6a   : > { %3115 = vmatpush3.msra.mxu0 %v255_v13  ;;  %3191 = vmatpush3.msra.mxu1 %v536_v26  ;;  %v823_v0 = vld [vmem:[#allocation5 + $0x178] sm:$0xff]  ;;  %v821_v2 = vld [vmem:[#allocation5 + $0x168] sm:$0xff]  ;;  %v820_v3 = vld [vmem:[#allocation5 + $0x160] sm:$0xff] }
  0x6b   : > { %3116 = vmatprep.subr.mxu0 %v254_v15  ;;  %3192 = vmatprep.subr.mxu1 %v535_v28  ;;  %v819_v4 = vld [vmem:[#allocation5 + $0x158] sm:$0xff]  ;;  %v818_v5 = vld [vmem:[#allocation5 + $0x150] sm:$0xff]  ;;  %v817_v6 = vld [vmem:[#allocation5 + $0x148] sm:$0xff] }
  0x6c   : > { %3117 = vmatpush3.msra.mxu0 %v254_v15  ;;  %3193 = vmatpush3.msra.mxu1 %v535_v28  ;;  %v816_v7 = vld [vmem:[#allocation5 + $0x140] sm:$0xff]  ;;  %v815_v8 = vld [vmem:[#allocation5 + $0x138] sm:$0xff]  ;;  %v814_v9 = vld [vmem:[#allocation5 + $0x130] sm:$0xff] }
  0x6d   : > { %3118 = vmatprep.subr.mxu0 %v253_v17  ;;  %3194 = vmatprep.subr.mxu1 %v534_v30  ;;  %v813_v10 = vld [vmem:[#allocation5 + $0x128] sm:$0xff]  ;;  %v812_v11 = vld [vmem:[#allocation5 + $0x120] sm:$0xff]  ;;  %v811_v12 = vld [vmem:[#allocation5 + $0x118] sm:$0xff] }
  0x6e   : > { %3119 = vmatpush3.msra.mxu0 %v253_v17  ;;  %3195 = vmatpush3.msra.mxu1 %v534_v30  ;;  %v810_v13 = vld [vmem:[#allocation5 + $0x110] sm:$0xff]  ;;  %v809_v14 = vld [vmem:[#allocation5 + $0x108] sm:$0xff]  ;;  %v4165_v15 = vld [vmem:[#allocation7] ss:$0 sm:$0xff] }
  0x6f   : > { %3120 = vmatprep.subr.mxu0 %v252_v19  ;;  %3196 = vmatprep.subr.mxu1 %v533_v32 }
  0x70   : > { %3121 = vmatpush3.msra.mxu0 %v252_v19  ;;  %3197 = vmatpush3.msra.mxu1 %v533_v32 }
  0x71   : > { %3122 = vmatprep.subr.mxu0 %v251_v21  ;;  %3198 = vmatprep.subr.mxu1 %v532_v60 }
  0x72   : > { %3123 = vmatpush3.msra.mxu0 %v251_v21  ;;  %3199 = vmatpush3.msra.mxu1 %v532_v60 }
  0x73   : > { %3124 = vmatprep.subr.mxu0 %v250_v23  ;;  %3200 = vmatprep.subr.mxu1 %v531_v61 }
  0x74   : > { %3125 = vmatpush3.msra.mxu0 %v250_v23  ;;  %3201 = vmatpush3.msra.mxu1 %v531_v61 }
  0x75   : > { %3127 = vmatmul.mubr.f32.vlgmr.msra.gmra.mxu0 %v219_v25  ;;  %3202 = vmatprep.subr.mxu1 %v530_v62 }
  0x76   : > { %3129 = vmatprep.mubr.f32.mxu0 %v220_v27  ;;  %3203 = vmatpush3.msra.mxu1 %v530_v62 }
  0x77   : > { %3204 = vmatprep.subr.mxu1 %v529_v63  ;;  %3254 = vmatprep.subr.mxu0 %v823_v0 }
  0x78   : > { %3205 = vmatpush3.msra.mxu1 %v529_v63  ;;  %3255 = vmatpush3.msra.mxu0 %v823_v0 }
  0x79   : > { %3130 = vmatmul.mubr.f32.gmra.mxu0 %v221_v29  ;;  %3256 = vmatprep.subr.mxu0 %v822_v1 }
  0x7a   : > { %3132 = vmatprep.mubr.f32.mxu0 %v222_v31  ;;  %3257 = vmatpush3.msra.mxu0 %v822_v1 }
  0x7b   : > { %3258 = vmatprep.subr.mxu0 %v821_v2 }
  0x7c   : > { %3259 = vmatpush3.msra.mxu0 %v821_v2 }
  0x7d   : > { %3133 = vmatmul.mubr.f32.gmra.mxu0 %v223_v33  ;;  %3260 = vmatprep.subr.mxu0 %v820_v3 }
  0x7e   : > { %3135 = vmatprep.mubr.f32.mxu0 %v224_v34  ;;  %3261 = vmatpush3.msra.mxu0 %v820_v3 }
  0x7f   : > { %3262 = vmatprep.subr.mxu0 %v819_v4 }
  0x80   : > { %3263 = vmatpush3.msra.mxu0 %v819_v4 }
  0x81   : > { %3136 = vmatmul.mubr.f32.gmra.mxu0 %v225_v35  ;;  %3264 = vmatprep.subr.mxu0 %v818_v5 }
  0x82   : > { %3138 = vmatprep.mubr.f32.mxu0 %v226_v36  ;;  %3265 = vmatpush3.msra.mxu0 %v818_v5 }
  0x83   : > { %3266 = vmatprep.subr.mxu0 %v817_v6 }
  0x84   : > { %3267 = vmatpush3.msra.mxu0 %v817_v6 }
  0x85   : > { %3139 = vmatmul.mubr.f32.gmra.mxu0 %v227_v37  ;;  %3268 = vmatprep.subr.mxu0 %v816_v7 }
  0x86   : > { %3141 = vmatprep.mubr.f32.mxu0 %v228_v38  ;;  %3269 = vmatpush3.msra.mxu0 %v816_v7 }
  0x87   : > { %3270 = vmatprep.subr.mxu0 %v815_v8 }
  0x88   : > { %3271 = vmatpush3.msra.mxu0 %v815_v8 }
  0x89   : > { %3142 = vmatmul.mubr.f32.gmra.mxu0 %v229_v39  ;;  %3272 = vmatprep.subr.mxu0 %v814_v9 }
  0x8a   : > { %3144 = vmatprep.mubr.f32.mxu0 %v230_v40  ;;  %3273 = vmatpush3.msra.mxu0 %v814_v9 }
  0x8b   : > { %3274 = vmatprep.subr.mxu0 %v813_v10 }
  0x8c   : > { %3275 = vmatpush3.msra.mxu0 %v813_v10 }
  0x8d   : > { %3145 = vmatmul.mubr.f32.gmra.mxu0 %v231_v41  ;;  %3276 = vmatprep.subr.mxu0 %v812_v11 }
  0x8e   : > { %3147 = vmatprep.mubr.f32.mxu0 %v232_v42  ;;  %3277 = vmatpush3.msra.mxu0 %v812_v11 }
  0x8f   : > { %3278 = vmatprep.subr.mxu0 %v811_v12 }
  0x90   : > { %3279 = vmatpush3.msra.mxu0 %v811_v12 }
  0x91   : > { %3148 = vmatmul.mubr.f32.gmra.mxu0 %v233_v43  ;;  %3280 = vmatprep.subr.mxu0 %v810_v13 }
  0x92   : > { %3150 = vmatprep.mubr.f32.mxu0 %v234_v44  ;;  %3281 = vmatpush3.msra.mxu0 %v810_v13 }
  0x93   : > { %3282 = vmatprep.subr.mxu0 %v809_v14 }
  0x94   : > { %3283 = vmatpush3.msra.mxu0 %v809_v14 }
  0x95   : > { %3151 = vmatmul.mubr.f32.gmra.mxu0 %v235_v45 }
  0x96   : > { %3153 = vmatprep.mubr.f32.mxu0 %v236_v46 }
  0x99   : > { %3154 = vmatmul.mubr.f32.gmra.mxu0 %v237_v47 }
  0x9a   : > { %3156 = vmatprep.mubr.f32.mxu0 %v238_v48 }
  0x9d   : > { %3157 = vmatmul.mubr.f32.gmra.mxu0 %v239_v49 }
  0x9e   : > { %3159 = vmatprep.mubr.f32.mxu0 %v240_v50 }
  0xa1   : > { %3160 = vmatmul.mubr.f32.gmra.mxu0 %v241_v51 }
  0xa2   : > { %3162 = vmatprep.mubr.f32.mxu0 %v242_v52 }
  0xa5   : > { %3163 = vmatmul.mubr.f32.gmra.mxu0 %v243_v53 }
  0xa6   : > { %3165 = vmatprep.mubr.f32.mxu0 %v244_v54 }
  0xa9   : > { %3166 = vmatmul.mubr.f32.gmra.mxu0 %v245_v55 }
  0xaa   : > { %3168 = vmatprep.mubr.f32.mxu0 %v246_v56 }
  0xad   : > { %3169 = vmatmul.mubr.f32.gmra.mxu0 %v247_v57 }
  0xae   : > { %3171 = vmatprep.mubr.f32.mxu0 %v248_v58 }
  0xb1   : > { %3172 = vmatmul.mubr.f32.gmra.mxu0 %v249_v59 }
 0x135   : > { %v3128_v16 = vpop.f32.mrf.mxu0 }
 0x136   : > { %v343_v17 = vadd.f32 %v3128_v16, %v4165_v15 }
 0x137   : > { %v337_v18 = vpop.f32.mrf.mxu0 }
 0x138   : > { %v497_v19 = vmax.f32 %v343_v17, 0.0  ;;  %v338_v20 = vadd.f32 %v4165_v15, %v337_v18 }
 0x139   : > { %v3131_v21 = vpop.f32.mrf.mxu0 }
 0x13a   : > { %2450 = vst [vmem:[%s4169_s20 + $0x30] sm:$0xff] %v497_v19  ;;  %v353_v22 = vadd.f32 %v3131_v21, %v4165_v15  ;;  %v496_v23 = vmax.f32 %v338_v20, 0.0 }
 0x13b   : > { %v347_v24 = vpop.f32.mrf.mxu0 }
 0x13c   : > { %v499_v25 = vmax.f32 %v353_v22, 0.0  ;;  %v348_v26 = vadd.f32 %v4165_v15, %v347_v24  ;;  %3206 = vmatprep.mubr.f32.mxu1 %v496_v23  ;;  %2449 = vst [vmem:[%s4169_s20 + $0x8] sm:$0xff] %v496_v23 }
 0x13d   : > { %v3134_v27 = vpop.f32.mrf.mxu0  ;;  %3207 = vmatmul.mubr.f32.vlgmr.msra.gmra.mxu1 %v497_v19 }
 0x13e   : > { %2452 = vst [vmem:[%s4169_s20 + $0x80] sm:$0xff] %v499_v25  ;;  %v498_v28 = vmax.f32 %v348_v26, 0.0  ;;  %v363_v29 = vadd.f32 %v3134_v27, %v4165_v15 }
 0x13f   : > { %v357_v30 = vpop.f32.mrf.mxu0 }
 0x140   : > { %2451 = vst [vmem:[%s4169_s20 + $0x58] sm:$0xff] %v498_v28  ;;  %v501_v31 = vmax.f32 %v363_v29, 0.0  ;;  %v358_v32 = vadd.f32 %v4165_v15, %v357_v30  ;;  %3209 = vmatprep.mubr.f32.mxu1 %v498_v28 }
 0x141   : > { %v3137_v33 = vpop.f32.mrf.mxu0  ;;  %3210 = vmatmul.mubr.f32.gmra.mxu1 %v499_v25 }
 0x142   : > { %2454 = vst [vmem:[%s4169_s20 + $0xd0] sm:$0xff] %v501_v31  ;;  %v500_v34 = vmax.f32 %v358_v32, 0.0  ;;  %v373_v35 = vadd.f32 %v3137_v33, %v4165_v15 }
 0x143   : > { %v367_v36 = vpop.f32.mrf.mxu0 }
 0x144   : > { %2453 = vst [vmem:[%s4169_s20 + $0xa8] sm:$0xff] %v500_v34  ;;  %v503_v37 = vmax.f32 %v373_v35, 0.0  ;;  %v368_v38 = vadd.f32 %v4165_v15, %v367_v36  ;;  %3212 = vmatprep.mubr.f32.mxu1 %v500_v34 }
 0x145   : > { %v3140_v39 = vpop.f32.mrf.mxu0  ;;  %3213 = vmatmul.mubr.f32.gmra.mxu1 %v501_v31 }
 0x146   : > { %2456 = vst [vmem:[%s4169_s20 + $0x120] sm:$0xff] %v503_v37  ;;  %v502_v40 = vmax.f32 %v368_v38, 0.0  ;;  %v383_v41 = vadd.f32 %v3140_v39, %v4165_v15 }
 0x147   : > { %v377_v42 = vpop.f32.mrf.mxu0 }
 0x148   : > { %2455 = vst [vmem:[%s4169_s20 + $0xf8] sm:$0xff] %v502_v40  ;;  %v505_v43 = vmax.f32 %v383_v41, 0.0  ;;  %v378_v44 = vadd.f32 %v4165_v15, %v377_v42  ;;  %3215 = vmatprep.mubr.f32.mxu1 %v502_v40 }
 0x149   : > { %v3143_v45 = vpop.f32.mrf.mxu0  ;;  %3216 = vmatmul.mubr.f32.gmra.mxu1 %v503_v37 }
 0x14a   : > { %2458 = vst [vmem:[%s4169_s20 + $0x170] sm:$0xff] %v505_v43  ;;  %v504_v46 = vmax.f32 %v378_v44, 0.0  ;;  %v393_v47 = vadd.f32 %v3143_v45, %v4165_v15 }
 0x14b   : > { %v387_v48 = vpop.f32.mrf.mxu0 }
 0x14c   : > { %2457 = vst [vmem:[%s4169_s20 + $0x148] sm:$0xff] %v504_v46  ;;  %v507_v49 = vmax.f32 %v393_v47, 0.0  ;;  %v388_v50 = vadd.f32 %v4165_v15, %v387_v48  ;;  %3218 = vmatprep.mubr.f32.mxu1 %v504_v46 }
 0x14d   : > { %v3146_v51 = vpop.f32.mrf.mxu0  ;;  %3219 = vmatmul.mubr.f32.gmra.mxu1 %v505_v43 }
 0x14e   : > { %2460 = vst [vmem:[%s4169_s20 + $0x1c0] sm:$0xff] %v507_v49  ;;  %v506_v52 = vmax.f32 %v388_v50, 0.0  ;;  %v403_v53 = vadd.f32 %v3146_v51, %v4165_v15  ;;  %v1102_v50 = vld [vmem:[#allocation5 + $0x1f8] sm:$0xff]  ;;  %v1101_v51 = vld [vmem:[#allocation5 + $0x1f0] sm:$0xff] }
 0x14f   : > { %v397_v54 = vpop.f32.mrf.mxu0  ;;  %3334 = vmatprep.subr.mxu1 %v1102_v50 }
 0x150   : > { %2459 = vst [vmem:[%s4169_s20 + $0x198] sm:$0xff] %v506_v52  ;;  %v509_v55 = vmax.f32 %v403_v53, 0.0  ;;  %v398_v56 = vadd.f32 %v4165_v15, %v397_v54  ;;  %3221 = vmatprep.mubr.f32.mxu1 %v506_v52  ;;  %3335 = vmatpush3.msra.mxu1 %v1102_v50  ;;  %v1100_v52 = vld [vmem:[#allocation5 + $0x1e8] sm:$0xff]  ;;  %v1099_v53 = vld [vmem:[#allocation5 + $0x1e0] sm:$0xff]  ;;  %v1097_v54 = vld [vmem:[#allocation5 + $0x1d0] sm:$0xff] }
 0x151   : > { %v3149_v57 = vpop.f32.mrf.mxu0  ;;  %3222 = vmatmul.mubr.f32.gmra.mxu1 %v507_v49  ;;  %v808_v49 = vld [vmem:[#allocation5 + $0x100] sm:$0xff]  ;;  %3336 = vmatprep.subr.mxu1 %v1101_v51 }
 0x152   : > { %2462 = vst [vmem:[%s4169_s20 + $0x210] sm:$0xff] %v509_v55  ;;  %v508_v58 = vmax.f32 %v398_v56, 0.0  ;;  %v413_v59 = vadd.f32 %v3149_v57, %v4165_v15  ;;  %3284 = vmatprep.subr.mxu0 %v808_v49  ;;  %3337 = vmatpush3.msra.mxu1 %v1101_v51  ;;  %v1095_v56 = vld [vmem:[#allocation5 + $0x1c0] sm:$0xff]  ;;  %v1094_v57 = vld [vmem:[#allocation5 + $0x1b8] sm:$0xff] }
 0x153   : > { %v407_v60 = vpop.f32.mrf.mxu0  ;;  %3285 = vmatpush3.msra.mxu0 %v808_v49  ;;  %3338 = vmatprep.subr.mxu1 %v1100_v52 }
 0x154   : > { %2461 = vst [vmem:[%s4169_s20 + $0x1e8] sm:$0xff] %v508_v58  ;;  %v511_v61 = vmax.f32 %v413_v59, 0.0  ;;  %v408_v62 = vadd.f32 %v4165_v15, %v407_v60  ;;  %3224 = vmatprep.mubr.f32.mxu1 %v508_v58  ;;  %3339 = vmatpush3.msra.mxu1 %v1100_v52  ;;  %v1093_v58 = vld [vmem:[#allocation5 + $0x1b0] sm:$0xff]  ;;  %v1092_v59 = vld [vmem:[#allocation5 + $0x1a8] sm:$0xff]  ;;  %v1091_v60 = vld [vmem:[#allocation5 + $0x1a0] sm:$0xff] }
 0x155   : > { %v3152_v63 = vpop.f32.mrf.mxu0  ;;  %3225 = vmatmul.mubr.f32.gmra.mxu1 %v509_v55  ;;  %3340 = vmatprep.subr.mxu1 %v1099_v53  ;;  %v1096_v55 = vld [vmem:[#allocation5 + $0x1c8] sm:$0xff] }
 0x156   : > { %2464 = vst [vmem:[%s4169_s20 + $0x260] sm:$0xff] %v511_v61  ;;  %v510_v0 = vmax.f32 %v408_v62, 0.0  ;;  %v423_v1 = vadd.f32 %v3152_v63, %v4165_v15  ;;  %3341 = vmatpush3.msra.mxu1 %v1099_v53  ;;  %v1089_v62 = vld [vmem:[#allocation5 + $0x190] sm:$0xff]  ;;  %v1088_v63 = vld [vmem:[#allocation5 + $0x188] sm:$0xff] }
 0x157   : > { %v417_v2 = vpop.f32.mrf.mxu0 }
 0x158   : > { %2463 = vst [vmem:[%s4169_s20 + $0x238] sm:$0xff] %v510_v0  ;;  %v513_v3 = vmax.f32 %v423_v1, 0.0  ;;  %v418_v4 = vadd.f32 %v4165_v15, %v417_v2  ;;  %3227 = vmatprep.mubr.f32.mxu1 %v510_v0  ;;  %v4233_v0 = vld [vmem:[#allocation7 + $0x1] ss:$0 sm:$0xff] }
 0x159   : > { %v3155_v5 = vpop.f32.mrf.mxu0  ;;  %3228 = vmatmul.mubr.f32.gmra.mxu1 %v511_v61  ;;  %v1090_v61 = vld [vmem:[#allocation5 + $0x198] sm:$0xff] }
 0x15a   : > { %2466 = vst [vmem:[%s4169_s20 + $0x2b0] sm:$0xff] %v513_v3  ;;  %v512_v6 = vmax.f32 %v418_v4, 0.0  ;;  %v433_v7 = vadd.f32 %v3155_v5, %v4165_v15 }
 0x15b   : > { %v427_v8 = vpop.f32.mrf.mxu0 }
 0x15c   : > { %2465 = vst [vmem:[%s4169_s20 + $0x288] sm:$0xff] %v512_v6  ;;  %v515_v9 = vmax.f32 %v433_v7, 0.0  ;;  %v428_v10 = vadd.f32 %v4165_v15, %v427_v8  ;;  %3230 = vmatprep.mubr.f32.mxu1 %v512_v6 }
 0x15d   : > { %v3158_v11 = vpop.f32.mrf.mxu0  ;;  %3231 = vmatmul.mubr.f32.gmra.mxu1 %v513_v3 }
 0x15e   : > { %2468 = vst [vmem:[%s4169_s20 + $0x300] sm:$0xff] %v515_v9  ;;  %v514_v12 = vmax.f32 %v428_v10, 0.0  ;;  %v443_v13 = vadd.f32 %v3158_v11, %v4165_v15 }
 0x15f   : > { %v437_v14 = vpop.f32.mrf.mxu0 }
 0x160   : > { %2467 = vst [vmem:[%s4169_s20 + $0x2d8] sm:$0xff] %v514_v12  ;;  %v517_v16 = vmax.f32 %v443_v13, 0.0  ;;  %v438_v17 = vadd.f32 %v4165_v15, %v437_v14  ;;  %3233 = vmatprep.mubr.f32.mxu1 %v514_v12 }
 0x161   : > { %v3161_v18 = vpop.f32.mrf.mxu0  ;;  %3234 = vmatmul.mubr.f32.gmra.mxu1 %v515_v9 }
 0x162   : > { %2470 = vst [vmem:[%s4169_s20 + $0x350] sm:$0xff] %v517_v16  ;;  %v516_v19 = vmax.f32 %v438_v17, 0.0  ;;  %v453_v20 = vadd.f32 %v3161_v18, %v4165_v15 }
 0x163   : > { %v447_v21 = vpop.f32.mrf.mxu0 }
 0x164   : > { %2469 = vst [vmem:[%s4169_s20 + $0x328] sm:$0xff] %v516_v19  ;;  %v519_v22 = vmax.f32 %v453_v20, 0.0  ;;  %v448_v23 = vadd.f32 %v4165_v15, %v447_v21  ;;  %3236 = vmatprep.mubr.f32.mxu1 %v516_v19 }
 0x165   : > { %v3164_v24 = vpop.f32.mrf.mxu0  ;;  %3237 = vmatmul.mubr.f32.gmra.mxu1 %v517_v16 }
 0x166   : > { %2472 = vst [vmem:[%s4169_s20 + $0x3a0] sm:$0xff] %v519_v22  ;;  %v518_v25 = vmax.f32 %v448_v23, 0.0  ;;  %v463_v26 = vadd.f32 %v3164_v24, %v4165_v15 }
 0x167   : > { %v457_v27 = vpop.f32.mrf.mxu0 }
 0x168   : > { %2471 = vst [vmem:[%s4169_s20 + $0x378] sm:$0xff] %v518_v25  ;;  %v521_v28 = vmax.f32 %v463_v26, 0.0  ;;  %v458_v29 = vadd.f32 %v4165_v15, %v457_v27  ;;  %3239 = vmatprep.mubr.f32.mxu1 %v518_v25 }
 0x169   : > { %v3167_v30 = vpop.f32.mrf.mxu0  ;;  %3240 = vmatmul.mubr.f32.gmra.mxu1 %v519_v22 }
 0x16a   : > { %2474 = vst [vmem:[%s4169_s20 + $0x3f0] sm:$0xff] %v521_v28  ;;  %v520_v31 = vmax.f32 %v458_v29, 0.0  ;;  %v473_v32 = vadd.f32 %v3167_v30, %v4165_v15 }
 0x16b   : > { %v467_v33 = vpop.f32.mrf.mxu0 }
 0x16c   : > { %2473 = vst [vmem:[%s4169_s20 + $0x3c8] sm:$0xff] %v520_v31  ;;  %v523_v34 = vmax.f32 %v473_v32, 0.0  ;;  %v468_v35 = vadd.f32 %v4165_v15, %v467_v33  ;;  %3242 = vmatprep.mubr.f32.mxu1 %v520_v31 }
 0x16d   : > { %v3170_v36 = vpop.f32.mrf.mxu0  ;;  %3243 = vmatmul.mubr.f32.gmra.mxu1 %v521_v28 }
 0x16e   : > { %2476 = vst [vmem:[%s4169_s20 + $0x440] sm:$0xff] %v523_v34  ;;  %v522_v37 = vmax.f32 %v468_v35, 0.0  ;;  %v483_v38 = vadd.f32 %v3170_v36, %v4165_v15 }
 0x16f   : > { %v477_v39 = vpop.f32.mrf.mxu0 }
 0x170   : > { %2475 = vst [vmem:[%s4169_s20 + $0x418] sm:$0xff] %v522_v37  ;;  %v525_v40 = vmax.f32 %v483_v38, 0.0  ;;  %v478_v41 = vadd.f32 %v4165_v15, %v477_v39  ;;  %3245 = vmatprep.mubr.f32.mxu1 %v522_v37 }
 0x171   : > { %v3173_v42 = vpop.f32.mrf.mxu0  ;;  %3246 = vmatmul.mubr.f32.gmra.mxu1 %v523_v34 }
 0x172   : > { %2478 = vst [vmem:[%s4169_s20 + $0x490] sm:$0xff] %v525_v40  ;;  %v524_v43 = vmax.f32 %v478_v41, 0.0  ;;  %v493_v44 = vadd.f32 %v3173_v42, %v4165_v15 }
 0x173   : > { %v487_v45 = vpop.f32.mrf.mxu0 }
 0x174   : > { %2477 = vst [vmem:[%s4169_s20 + $0x468] sm:$0xff] %v524_v43  ;;  %v527_v46 = vmax.f32 %v493_v44, 0.0  ;;  %v488_v47 = vadd.f32 %v4165_v15, %v487_v45  ;;  %3248 = vmatprep.mubr.f32.mxu1 %v524_v43  ;;  %v1098_v15 = vld [vmem:[#allocation5 + $0x1d8] sm:$0xff] }
 0x175   : > { %3249 = vmatmul.mubr.f32.gmra.mxu1 %v525_v40  ;;  %3342 = vmatprep.subr.mxu1 %v1098_v15 }
 0x176   : > { %2480 = vst [vmem:[%s4169_s20 + $0x4e0] sm:$0xff] %v527_v46  ;;  %v526_v48 = vmax.f32 %v488_v47, 0.0  ;;  %3343 = vmatpush3.msra.mxu1 %v1098_v15 }
 0x177   : > { %3344 = vmatprep.subr.mxu1 %v1097_v54 }
 0x178   : > { %2479 = vst [vmem:[%s4169_s20 + $0x4b8] sm:$0xff] %v526_v48  ;;  %3251 = vmatprep.mubr.f32.mxu1 %v526_v48  ;;  %3345 = vmatpush3.msra.mxu1 %v1097_v54 }
 0x179   : > { %3252 = vmatmul.mubr.f32.gmra.mxu1 %v527_v46  ;;  %3346 = vmatprep.subr.mxu1 %v1096_v55 }
 0x17a   : > { %3347 = vmatpush3.msra.mxu1 %v1096_v55 }
 0x17b   : > { %3348 = vmatprep.subr.mxu1 %v1095_v56 }
 0x17c   : > { %3349 = vmatpush3.msra.mxu1 %v1095_v56 }
 0x17d   : > { %3350 = vmatprep.subr.mxu1 %v1094_v57 }
 0x17e   : > { %3351 = vmatpush3.msra.mxu1 %v1094_v57 }
 0x17f   : > { %3352 = vmatprep.subr.mxu1 %v1093_v58 }
 0x180   : > { %3353 = vmatpush3.msra.mxu1 %v1093_v58 }
 0x181   : > { %3354 = vmatprep.subr.mxu1 %v1092_v59 }
 0x182   : > { %3355 = vmatpush3.msra.mxu1 %v1092_v59 }
 0x183   : > { %3356 = vmatprep.subr.mxu1 %v1091_v60 }
 0x184   : > { %3357 = vmatpush3.msra.mxu1 %v1091_v60 }
 0x185   : > { %3358 = vmatprep.subr.mxu1 %v1090_v61 }
 0x186   : > { %3359 = vmatpush3.msra.mxu1 %v1090_v61 }
 0x187   : > { %3360 = vmatprep.subr.mxu1 %v1089_v62 }
 0x188   : > { %3361 = vmatpush3.msra.mxu1 %v1089_v62 }
 0x189   : > { %3362 = vmatprep.subr.mxu1 %v1088_v63 }
 0x18a   : > { %3363 = vmatpush3.msra.mxu1 %v1088_v63 }
 0x1fd   : > { %v3208_v1 = vpop.f32.mrf.mxu1 }
 0x1fe   : > { %v622_v2 = vadd.f32 %v3208_v1, %v4233_v0 }
 0x1ff   : > { %v616_v3 = vpop.f32.mrf.mxu1 }
 0x200   : > { %v776_v4 = vmax.f32 %v622_v2, 0.0  ;;  %v617_v5 = vadd.f32 %v4233_v0, %v616_v3 }
 0x201   : > { %v3211_v6 = vpop.f32.mrf.mxu1 }
 0x202   : > { %2482 = vst [vmem:[%s4169_s20 + $0x38] sm:$0xff] %v776_v4  ;;  %v775_v7 = vmax.f32 %v617_v5, 0.0  ;;  %v632_v8 = vadd.f32 %v3211_v6, %v4233_v0 }
 0x203   : > { %v626_v9 = vpop.f32.mrf.mxu1 }
 0x204   : > { %2481 = vst [vmem:[%s4169_s20 + $0x10] sm:$0xff] %v775_v7  ;;  %v778_v10 = vmax.f32 %v632_v8, 0.0  ;;  %v627_v11 = vadd.f32 %v4233_v0, %v626_v9  ;;  %3286 = vmatprep.mubr.f32.mxu0 %v775_v7 }
 0x205   : > { %v3214_v12 = vpop.f32.mrf.mxu1  ;;  %3287 = vmatmul.mubr.f32.vlgmr.msra.gmra.mxu0 %v776_v4 }
 0x206   : > { %2484 = vst [vmem:[%s4169_s20 + $0x88] sm:$0xff] %v778_v10  ;;  %v777_v13 = vmax.f32 %v627_v11, 0.0  ;;  %v642_v14 = vadd.f32 %v3214_v12, %v4233_v0 }
 0x207   : > { %v636_v16 = vpop.f32.mrf.mxu1 }
 0x208   : > { %2483 = vst [vmem:[%s4169_s20 + $0x60] sm:$0xff] %v777_v13  ;;  %v780_v17 = vmax.f32 %v642_v14, 0.0  ;;  %v637_v18 = vadd.f32 %v4233_v0, %v636_v16  ;;  %3289 = vmatprep.mubr.f32.mxu0 %v777_v13 }
 0x209   : > { %v3217_v19 = vpop.f32.mrf.mxu1  ;;  %3290 = vmatmul.mubr.f32.gmra.mxu0 %v778_v10 }
 0x20a   : > { %2486 = vst [vmem:[%s4169_s20 + $0xd8] sm:$0xff] %v780_v17  ;;  %v779_v20 = vmax.f32 %v637_v18, 0.0  ;;  %v652_v21 = vadd.f32 %v3217_v19, %v4233_v0 }
 0x20b   : > { %v646_v22 = vpop.f32.mrf.mxu1 }
 0x20c   : > { %2485 = vst [vmem:[%s4169_s20 + $0xb0] sm:$0xff] %v779_v20  ;;  %v782_v23 = vmax.f32 %v652_v21, 0.0  ;;  %v647_v24 = vadd.f32 %v4233_v0, %v646_v22  ;;  %3292 = vmatprep.mubr.f32.mxu0 %v779_v20 }
 0x20d   : > { %v3220_v25 = vpop.f32.mrf.mxu1  ;;  %3293 = vmatmul.mubr.f32.gmra.mxu0 %v780_v17 }
 0x20e   : > { %2488 = vst [vmem:[%s4169_s20 + $0x128] sm:$0xff] %v782_v23  ;;  %v781_v26 = vmax.f32 %v647_v24, 0.0  ;;  %v662_v27 = vadd.f32 %v3220_v25, %v4233_v0 }
 0x20f   : > { %v656_v28 = vpop.f32.mrf.mxu1 }
 0x210   : > { %2487 = vst [vmem:[%s4169_s20 + $0x100] sm:$0xff] %v781_v26  ;;  %v784_v29 = vmax.f32 %v662_v27, 0.0  ;;  %v657_v30 = vadd.f32 %v4233_v0, %v656_v28  ;;  %3295 = vmatprep.mubr.f32.mxu0 %v781_v26 }
 0x211   : > { %v3223_v31 = vpop.f32.mrf.mxu1  ;;  %3296 = vmatmul.mubr.f32.gmra.mxu0 %v782_v23 }
 0x212   : > { %2490 = vst [vmem:[%s4169_s20 + $0x178] sm:$0xff] %v784_v29  ;;  %v783_v32 = vmax.f32 %v657_v30, 0.0  ;;  %v672_v33 = vadd.f32 %v3223_v31, %v4233_v0 }
 0x213   : > { %v666_v34 = vpop.f32.mrf.mxu1 }
 0x214   : > { %2489 = vst [vmem:[%s4169_s20 + $0x150] sm:$0xff] %v783_v32  ;;  %v786_v35 = vmax.f32 %v672_v33, 0.0  ;;  %v667_v36 = vadd.f32 %v4233_v0, %v666_v34  ;;  %3298 = vmatprep.mubr.f32.mxu0 %v783_v32 }
 0x215   : > { %v3226_v37 = vpop.f32.mrf.mxu1  ;;  %3299 = vmatmul.mubr.f32.gmra.mxu0 %v784_v29 }
 0x216   : > { %2492 = vst [vmem:[%s4169_s20 + $0x1c8] sm:$0xff] %v786_v35  ;;  %v785_v38 = vmax.f32 %v667_v36, 0.0  ;;  %v682_v39 = vadd.f32 %v3226_v37, %v4233_v0  ;;  %v1349_v36 = vld [vmem:[#allocation5 + $0x278] sm:$0xff]  ;;  %v1348_v37 = vld [vmem:[#allocation5 + $0x270] sm:$0xff] }
 0x217   : > { %v676_v40 = vpop.f32.mrf.mxu1  ;;  %3414 = vmatprep.subr.mxu0 %v1349_v36 }
 0x218   : > { %2491 = vst [vmem:[%s4169_s20 + $0x1a0] sm:$0xff] %v785_v38  ;;  %v788_v41 = vmax.f32 %v682_v39, 0.0  ;;  %v677_v42 = vadd.f32 %v4233_v0, %v676_v40  ;;  %3301 = vmatprep.mubr.f32.mxu0 %v785_v38  ;;  %3415 = vmatpush3.msra.mxu0 %v1349_v36  ;;  %v1347_v38 = vld [vmem:[#allocation5 + $0x268] sm:$0xff]  ;;  %v1346_v39 = vld [vmem:[#allocation5 + $0x260] sm:$0xff]  ;;  %v1344_v40 = vld [vmem:[#allocation5 + $0x250] sm:$0xff] }
 0x219   : > { %v3229_v43 = vpop.f32.mrf.mxu1  ;;  %3302 = vmatmul.mubr.f32.gmra.mxu0 %v786_v35  ;;  %v1087_v35 = vld [vmem:[#allocation5 + $0x180] sm:$0xff]  ;;  %3416 = vmatprep.subr.mxu0 %v1348_v37 }
 0x21a   : > { %2494 = vst [vmem:[%s4169_s20 + $0x218] sm:$0xff] %v788_v41  ;;  %v787_v44 = vmax.f32 %v677_v42, 0.0  ;;  %v692_v45 = vadd.f32 %v3229_v43, %v4233_v0  ;;  %3364 = vmatprep.subr.mxu1 %v1087_v35  ;;  %3417 = vmatpush3.msra.mxu0 %v1348_v37  ;;  %v1342_v42 = vld [vmem:[#allocation5 + $0x240] sm:$0xff]  ;;  %v1341_v43 = vld [vmem:[#allocation5 + $0x238] sm:$0xff] }
 0x21b   : > { %v686_v46 = vpop.f32.mrf.mxu1  ;;  %3365 = vmatpush3.msra.mxu1 %v1087_v35  ;;  %3418 = vmatprep.subr.mxu0 %v1347_v38 }
 0x21c   : > { %2493 = vst [vmem:[%s4169_s20 + $0x1f0] sm:$0xff] %v787_v44  ;;  %v790_v47 = vmax.f32 %v692_v45, 0.0  ;;  %v687_v48 = vadd.f32 %v4233_v0, %v686_v46  ;;  %3304 = vmatprep.mubr.f32.mxu0 %v787_v44  ;;  %3419 = vmatpush3.msra.mxu0 %v1347_v38  ;;  %v1340_v44 = vld [vmem:[#allocation5 + $0x230] sm:$0xff]  ;;  %v1339_v45 = vld [vmem:[#allocation5 + $0x228] sm:$0xff]  ;;  %v1338_v46 = vld [vmem:[#allocation5 + $0x220] sm:$0xff] }
 0x21d   : > { %v3232_v49 = vpop.f32.mrf.mxu1  ;;  %3305 = vmatmul.mubr.f32.gmra.mxu0 %v788_v41  ;;  %3420 = vmatprep.subr.mxu0 %v1346_v39  ;;  %v1343_v41 = vld [vmem:[#allocation5 + $0x248] sm:$0xff] }
 0x21e   : > { %2496 = vst [vmem:[%s4169_s20 + $0x268] sm:$0xff] %v790_v47  ;;  %v789_v50 = vmax.f32 %v687_v48, 0.0  ;;  %v702_v51 = vadd.f32 %v3232_v49, %v4233_v0  ;;  %3421 = vmatpush3.msra.mxu0 %v1346_v39  ;;  %v1336_v48 = vld [vmem:[#allocation5 + $0x210] sm:$0xff]  ;;  %v1335_v49 = vld [vmem:[#allocation5 + $0x208] sm:$0xff] }
 0x21f   : > { %v696_v52 = vpop.f32.mrf.mxu1 }
 0x220   : > { %2495 = vst [vmem:[%s4169_s20 + $0x240] sm:$0xff] %v789_v50  ;;  %v792_v53 = vmax.f32 %v702_v51, 0.0  ;;  %v697_v15 = vadd.f32 %v4233_v0, %v696_v52  ;;  %3307 = vmatprep.mubr.f32.mxu0 %v789_v50  ;;  %v4299_v50 = vld [vmem:[#allocation7 + $0x2] ss:$0 sm:$0xff] }
 0x221   : > { %v3235_v54 = vpop.f32.mrf.mxu1  ;;  %3308 = vmatmul.mubr.f32.gmra.mxu0 %v790_v47  ;;  %v1337_v47 = vld [vmem:[#allocation5 + $0x218] sm:$0xff] }
 0x222   : > { %2498 = vst [vmem:[%s4169_s20 + $0x2b8] sm:$0xff] %v792_v53  ;;  %v791_v55 = vmax.f32 %v697_v15, 0.0  ;;  %v712_v56 = vadd.f32 %v3235_v54, %v4233_v0 }
 0x223   : > { %v706_v57 = vpop.f32.mrf.mxu1 }
 0x224   : > { %2497 = vst [vmem:[%s4169_s20 + $0x290] sm:$0xff] %v791_v55  ;;  %v794_v58 = vmax.f32 %v712_v56, 0.0  ;;  %v707_v59 = vadd.f32 %v4233_v0, %v706_v57  ;;  %3310 = vmatprep.mubr.f32.mxu0 %v791_v55 }
 0x225   : > { %v3238_v60 = vpop.f32.mrf.mxu1  ;;  %3311 = vmatmul.mubr.f32.gmra.mxu0 %v792_v53 }
 0x226   : > { %2500 = vst [vmem:[%s4169_s20 + $0x308] sm:$0xff] %v794_v58  ;;  %v793_v61 = vmax.f32 %v707_v59, 0.0  ;;  %v722_v62 = vadd.f32 %v3238_v60, %v4233_v0 }
 0x227   : > { %v716_v63 = vpop.f32.mrf.mxu1 }
 0x228   : > { %2499 = vst [vmem:[%s4169_s20 + $0x2e0] sm:$0xff] %v793_v61  ;;  %v796_v1 = vmax.f32 %v722_v62, 0.0  ;;  %v717_v2 = vadd.f32 %v4233_v0, %v716_v63  ;;  %3313 = vmatprep.mubr.f32.mxu0 %v793_v61 }
 0x229   : > { %v3241_v3 = vpop.f32.mrf.mxu1  ;;  %3314 = vmatmul.mubr.f32.gmra.mxu0 %v794_v58 }
 0x22a   : > { %2502 = vst [vmem:[%s4169_s20 + $0x358] sm:$0xff] %v796_v1  ;;  %v795_v4 = vmax.f32 %v717_v2, 0.0  ;;  %v732_v5 = vadd.f32 %v3241_v3, %v4233_v0 }
 0x22b   : > { %v726_v6 = vpop.f32.mrf.mxu1 }
 0x22c   : > { %2501 = vst [vmem:[%s4169_s20 + $0x330] sm:$0xff] %v795_v4  ;;  %v798_v7 = vmax.f32 %v732_v5, 0.0  ;;  %v727_v8 = vadd.f32 %v4233_v0, %v726_v6  ;;  %3316 = vmatprep.mubr.f32.mxu0 %v795_v4 }
 0x22d   : > { %v3244_v9 = vpop.f32.mrf.mxu1  ;;  %3317 = vmatmul.mubr.f32.gmra.mxu0 %v796_v1 }
 0x22e   : > { %2504 = vst [vmem:[%s4169_s20 + $0x3a8] sm:$0xff] %v798_v7  ;;  %v797_v10 = vmax.f32 %v727_v8, 0.0  ;;  %v742_v11 = vadd.f32 %v3244_v9, %v4233_v0 }
 0x22f   : > { %v736_v12 = vpop.f32.mrf.mxu1 }
 0x230   : > { %2503 = vst [vmem:[%s4169_s20 + $0x380] sm:$0xff] %v797_v10  ;;  %v800_v13 = vmax.f32 %v742_v11, 0.0  ;;  %v737_v14 = vadd.f32 %v4233_v0, %v736_v12  ;;  %3319 = vmatprep.mubr.f32.mxu0 %v797_v10 }
 0x231   : > { %v3247_v16 = vpop.f32.mrf.mxu1  ;;  %3320 = vmatmul.mubr.f32.gmra.mxu0 %v798_v7 }
 0x232   : > { %2506 = vst [vmem:[%s4169_s20 + $0x3f8] sm:$0xff] %v800_v13  ;;  %v799_v17 = vmax.f32 %v737_v14, 0.0  ;;  %v752_v18 = vadd.f32 %v3247_v16, %v4233_v0 }
 0x233   : > { %v746_v19 = vpop.f32.mrf.mxu1 }
 0x234   : > { %2505 = vst [vmem:[%s4169_s20 + $0x3d0] sm:$0xff] %v799_v17  ;;  %v802_v20 = vmax.f32 %v752_v18, 0.0  ;;  %v747_v21 = vadd.f32 %v4233_v0, %v746_v19  ;;  %3322 = vmatprep.mubr.f32.mxu0 %v799_v17 }
 0x235   : > { %v3250_v22 = vpop.f32.mrf.mxu1  ;;  %3323 = vmatmul.mubr.f32.gmra.mxu0 %v800_v13 }
 0x236   : > { %2508 = vst [vmem:[%s4169_s20 + $0x448] sm:$0xff] %v802_v20  ;;  %v801_v23 = vmax.f32 %v747_v21, 0.0  ;;  %v762_v24 = vadd.f32 %v3250_v22, %v4233_v0 }
 0x237   : > { %v756_v25 = vpop.f32.mrf.mxu1 }
 0x238   : > { %2507 = vst [vmem:[%s4169_s20 + $0x420] sm:$0xff] %v801_v23  ;;  %v804_v26 = vmax.f32 %v762_v24, 0.0  ;;  %v757_v27 = vadd.f32 %v4233_v0, %v756_v25  ;;  %3325 = vmatprep.mubr.f32.mxu0 %v801_v23 }
 0x239   : > { %v3253_v28 = vpop.f32.mrf.mxu1  ;;  %3326 = vmatmul.mubr.f32.gmra.mxu0 %v802_v20 }
 0x23a   : > { %2510 = vst [vmem:[%s4169_s20 + $0x498] sm:$0xff] %v804_v26  ;;  %v803_v29 = vmax.f32 %v757_v27, 0.0  ;;  %v772_v30 = vadd.f32 %v3253_v28, %v4233_v0 }
 0x23b   : > { %v766_v31 = vpop.f32.mrf.mxu1 }
 0x23c   : > { %2509 = vst [vmem:[%s4169_s20 + $0x470] sm:$0xff] %v803_v29  ;;  %v806_v32 = vmax.f32 %v772_v30, 0.0  ;;  %v767_v33 = vadd.f32 %v4233_v0, %v766_v31  ;;  %3328 = vmatprep.mubr.f32.mxu0 %v803_v29  ;;  %v1345_v0 = vld [vmem:[#allocation5 + $0x258] sm:$0xff] }
 0x23d   : > { %3329 = vmatmul.mubr.f32.gmra.mxu0 %v804_v26  ;;  %3422 = vmatprep.subr.mxu0 %v1345_v0 }
 0x23e   : > { %2512 = vst [vmem:[%s4169_s20 + $0x4e8] sm:$0xff] %v806_v32  ;;  %v805_v34 = vmax.f32 %v767_v33, 0.0  ;;  %3423 = vmatpush3.msra.mxu0 %v1345_v0 }
 0x23f   : > { %3424 = vmatprep.subr.mxu0 %v1344_v40 }
 0x240   : > { %2511 = vst [vmem:[%s4169_s20 + $0x4c0] sm:$0xff] %v805_v34  ;;  %3331 = vmatprep.mubr.f32.mxu0 %v805_v34  ;;  %3425 = vmatpush3.msra.mxu0 %v1344_v40 }
 0x241   : > { %3332 = vmatmul.mubr.f32.gmra.mxu0 %v806_v32  ;;  %3426 = vmatprep.subr.mxu0 %v1343_v41 }
 0x242   : > { %3427 = vmatpush3.msra.mxu0 %v1343_v41 }
 0x243   : > { %3428 = vmatprep.subr.mxu0 %v1342_v42 }
 0x244   : > { %3429 = vmatpush3.msra.mxu0 %v1342_v42 }
 0x245   : > { %3430 = vmatprep.subr.mxu0 %v1341_v43 }
 0x246   : > { %3431 = vmatpush3.msra.mxu0 %v1341_v43 }
 0x247   : > { %3432 = vmatprep.subr.mxu0 %v1340_v44 }
 0x248   : > { %3433 = vmatpush3.msra.mxu0 %v1340_v44 }
 0x249   : > { %3434 = vmatprep.subr.mxu0 %v1339_v45 }
 0x24a   : > { %3435 = vmatpush3.msra.mxu0 %v1339_v45 }
 0x24b   : > { %3436 = vmatprep.subr.mxu0 %v1338_v46 }
 0x24c   : > { %3437 = vmatpush3.msra.mxu0 %v1338_v46 }
 0x24d   : > { %3438 = vmatprep.subr.mxu0 %v1337_v47 }
 0x24e   : > { %3439 = vmatpush3.msra.mxu0 %v1337_v47 }
 0x24f   : > { %3440 = vmatprep.subr.mxu0 %v1336_v48 }
 0x250   : > { %3441 = vmatpush3.msra.mxu0 %v1336_v48 }
 0x251   : > { %3442 = vmatprep.subr.mxu0 %v1335_v49 }
 0x252   : > { %3443 = vmatpush3.msra.mxu0 %v1335_v49 }
 0x2c5   : > { %v3288_v51 = vpop.f32.mrf.mxu0 }
 0x2c6   : > { %v901_v52 = vadd.f32 %v3288_v51, %v4299_v50 }
 0x2c7   : > { %v895_v53 = vpop.f32.mrf.mxu0 }
 0x2c8   : > { %v1055_v15 = vmax.f32 %v901_v52, 0.0  ;;  %v896_v54 = vadd.f32 %v4299_v50, %v895_v53 }
 0x2c9   : > { %v3291_v55 = vpop.f32.mrf.mxu0 }
 0x2ca   : > { %2514 = vst [vmem:[%s4169_s20 + $0x40] sm:$0xff] %v1055_v15  ;;  %v1054_v56 = vmax.f32 %v896_v54, 0.0  ;;  %v911_v57 = vadd.f32 %v3291_v55, %v4299_v50 }
 0x2cb   : > { %v905_v58 = vpop.f32.mrf.mxu0 }
 0x2cc   : > { %2513 = vst [vmem:[%s4169_s20 + $0x18] sm:$0xff] %v1054_v56  ;;  %v1057_v59 = vmax.f32 %v911_v57, 0.0  ;;  %v906_v60 = vadd.f32 %v4299_v50, %v905_v58  ;;  %3366 = vmatprep.mubr.f32.mxu1 %v1054_v56 }
 0x2cd   : > { %v3294_v61 = vpop.f32.mrf.mxu0  ;;  %3367 = vmatmul.mubr.f32.vlgmr.msra.gmra.mxu1 %v1055_v15 }
 0x2ce   : > { %2516 = vst [vmem:[%s4169_s20 + $0x90] sm:$0xff] %v1057_v59  ;;  %v1056_v62 = vmax.f32 %v906_v60, 0.0  ;;  %v921_v63 = vadd.f32 %v3294_v61, %v4299_v50 }
 0x2cf   : > { %v915_v1 = vpop.f32.mrf.mxu0 }
 0x2d0   : > { %2515 = vst [vmem:[%s4169_s20 + $0x68] sm:$0xff] %v1056_v62  ;;  %v1059_v2 = vmax.f32 %v921_v63, 0.0  ;;  %v916_v3 = vadd.f32 %v4299_v50, %v915_v1  ;;  %3369 = vmatprep.mubr.f32.mxu1 %v1056_v62 }
 0x2d1   : > { %v3297_v4 = vpop.f32.mrf.mxu0  ;;  %3370 = vmatmul.mubr.f32.gmra.mxu1 %v1057_v59 }
 0x2d2   : > { %2518 = vst [vmem:[%s4169_s20 + $0xe0] sm:$0xff] %v1059_v2  ;;  %v1058_v5 = vmax.f32 %v916_v3, 0.0  ;;  %v931_v6 = vadd.f32 %v3297_v4, %v4299_v50 }
 0x2d3   : > { %v925_v7 = vpop.f32.mrf.mxu0 }
 0x2d4   : > { %2517 = vst [vmem:[%s4169_s20 + $0xb8] sm:$0xff] %v1058_v5  ;;  %v1061_v8 = vmax.f32 %v931_v6, 0.0  ;;  %v926_v9 = vadd.f32 %v4299_v50, %v925_v7  ;;  %3372 = vmatprep.mubr.f32.mxu1 %v1058_v5 }
 0x2d5   : > { %v3300_v10 = vpop.f32.mrf.mxu0  ;;  %3373 = vmatmul.mubr.f32.gmra.mxu1 %v1059_v2 }
 0x2d6   : > { %2520 = vst [vmem:[%s4169_s20 + $0x130] sm:$0xff] %v1061_v8  ;;  %v1060_v11 = vmax.f32 %v926_v9, 0.0  ;;  %v941_v12 = vadd.f32 %v3300_v10, %v4299_v50 }
 0x2d7   : > { %v935_v13 = vpop.f32.mrf.mxu0 }
 0x2d8   : > { %2519 = vst [vmem:[%s4169_s20 + $0x108] sm:$0xff] %v1060_v11  ;;  %v1063_v14 = vmax.f32 %v941_v12, 0.0  ;;  %v936_v16 = vadd.f32 %v4299_v50, %v935_v13  ;;  %3375 = vmatprep.mubr.f32.mxu1 %v1060_v11 }
 0x2d9   : > { %v3303_v17 = vpop.f32.mrf.mxu0  ;;  %3376 = vmatmul.mubr.f32.gmra.mxu1 %v1061_v8 }
 0x2da   : > { %2522 = vst [vmem:[%s4169_s20 + $0x180] sm:$0xff] %v1063_v14  ;;  %v1062_v18 = vmax.f32 %v936_v16, 0.0  ;;  %v951_v19 = vadd.f32 %v3303_v17, %v4299_v50 }
 0x2db   : > { %v945_v20 = vpop.f32.mrf.mxu0 }
 0x2dc   : > { %2521 = vst [vmem:[%s4169_s20 + $0x158] sm:$0xff] %v1062_v18  ;;  %v1065_v21 = vmax.f32 %v951_v19, 0.0  ;;  %v946_v22 = vadd.f32 %v4299_v50, %v945_v20  ;;  %3378 = vmatprep.mubr.f32.mxu1 %v1062_v18 }
 0x2dd   : > { %v3306_v23 = vpop.f32.mrf.mxu0  ;;  %3379 = vmatmul.mubr.f32.gmra.mxu1 %v1063_v14 }
 0x2de   : > { %2524 = vst [vmem:[%s4169_s20 + $0x1d0] sm:$0xff] %v1065_v21  ;;  %v1064_v24 = vmax.f32 %v946_v22, 0.0  ;;  %v961_v25 = vadd.f32 %v3306_v23, %v4299_v50  ;;  %v1628_v22 = vld [vmem:[#allocation5 + $0x2f8] sm:$0xff]  ;;  %v1627_v23 = vld [vmem:[#allocation5 + $0x2f0] sm:$0xff] }
 0x2df   : > { %v955_v26 = vpop.f32.mrf.mxu0  ;;  %3494 = vmatprep.subr.mxu1 %v1628_v22 }
 0x2e0   : > { %2523 = vst [vmem:[%s4169_s20 + $0x1a8] sm:$0xff] %v1064_v24  ;;  %v1067_v27 = vmax.f32 %v961_v25, 0.0  ;;  %v956_v28 = vadd.f32 %v4299_v50, %v955_v26  ;;  %3381 = vmatprep.mubr.f32.mxu1 %v1064_v24  ;;  %3495 = vmatpush3.msra.mxu1 %v1628_v22  ;;  %v1626_v24 = vld [vmem:[#allocation5 + $0x2e8] sm:$0xff]  ;;  %v1625_v25 = vld [vmem:[#allocation5 + $0x2e0] sm:$0xff]  ;;  %v1623_v26 = vld [vmem:[#allocation5 + $0x2d0] sm:$0xff] }
 0x2e1   : > { %v3309_v29 = vpop.f32.mrf.mxu0  ;;  %3382 = vmatmul.mubr.f32.gmra.mxu1 %v1065_v21  ;;  %v1334_v21 = vld [vmem:[#allocation5 + $0x200] sm:$0xff]  ;;  %3496 = vmatprep.subr.mxu1 %v1627_v23 }
 0x2e2   : > { %2526 = vst [vmem:[%s4169_s20 + $0x220] sm:$0xff] %v1067_v27  ;;  %v1066_v30 = vmax.f32 %v956_v28, 0.0  ;;  %v971_v31 = vadd.f32 %v3309_v29, %v4299_v50  ;;  %3444 = vmatprep.subr.mxu0 %v1334_v21  ;;  %3497 = vmatpush3.msra.mxu1 %v1627_v23  ;;  %v1621_v28 = vld [vmem:[#allocation5 + $0x2c0] sm:$0xff]  ;;  %v1620_v29 = vld [vmem:[#allocation5 + $0x2b8] sm:$0xff] }
 0x2e3   : > { %v965_v32 = vpop.f32.mrf.mxu0  ;;  %3445 = vmatpush3.msra.mxu0 %v1334_v21  ;;  %3498 = vmatprep.subr.mxu1 %v1626_v24 }
 0x2e4   : > { %2525 = vst [vmem:[%s4169_s20 + $0x1f8] sm:$0xff] %v1066_v30  ;;  %v1069_v33 = vmax.f32 %v971_v31, 0.0  ;;  %v966_v34 = vadd.f32 %v4299_v50, %v965_v32  ;;  %3384 = vmatprep.mubr.f32.mxu1 %v1066_v30  ;;  %3499 = vmatpush3.msra.mxu1 %v1626_v24  ;;  %v1619_v30 = vld [vmem:[#allocation5 + $0x2b0] sm:$0xff]  ;;  %v1618_v31 = vld [vmem:[#allocation5 + $0x2a8] sm:$0xff]  ;;  %v1617_v32 = vld [vmem:[#allocation5 + $0x2a0] sm:$0xff] }
 0x2e5   : > { %v3312_v35 = vpop.f32.mrf.mxu0  ;;  %3385 = vmatmul.mubr.f32.gmra.mxu1 %v1067_v27  ;;  %3500 = vmatprep.subr.mxu1 %v1625_v25  ;;  %v1622_v27 = vld [vmem:[#allocation5 + $0x2c8] sm:$0xff] }
 0x2e6   : > { %2528 = vst [vmem:[%s4169_s20 + $0x270] sm:$0xff] %v1069_v33  ;;  %v1068_v36 = vmax.f32 %v966_v34, 0.0  ;;  %v981_v37 = vadd.f32 %v3312_v35, %v4299_v50  ;;  %3501 = vmatpush3.msra.mxu1 %v1625_v25  ;;  %v1615_v34 = vld [vmem:[#allocation5 + $0x290] sm:$0xff]  ;;  %v1614_v35 = vld [vmem:[#allocation5 + $0x288] sm:$0xff] }
 0x2e7   : > { %v975_v38 = vpop.f32.mrf.mxu0 }
 0x2e8   : > { %2527 = vst [vmem:[%s4169_s20 + $0x248] sm:$0xff] %v1068_v36  ;;  %v1071_v39 = vmax.f32 %v981_v37, 0.0  ;;  %v976_v0 = vadd.f32 %v4299_v50, %v975_v38  ;;  %3387 = vmatprep.mubr.f32.mxu1 %v1068_v36  ;;  %v4365_v36 = vld [vmem:[#allocation7 + $0x3] ss:$0 sm:$0xff] }
 0x2e9   : > { %v3315_v40 = vpop.f32.mrf.mxu0  ;;  %3388 = vmatmul.mubr.f32.gmra.mxu1 %v1069_v33  ;;  %v1616_v33 = vld [vmem:[#allocation5 + $0x298] sm:$0xff] }
 0x2ea   : > { %2530 = vst [vmem:[%s4169_s20 + $0x2c0] sm:$0xff] %v1071_v39  ;;  %v1070_v41 = vmax.f32 %v976_v0, 0.0  ;;  %v991_v42 = vadd.f32 %v3315_v40, %v4299_v50 }
 0x2eb   : > { %v985_v43 = vpop.f32.mrf.mxu0 }
 0x2ec   : > { %2529 = vst [vmem:[%s4169_s20 + $0x298] sm:$0xff] %v1070_v41  ;;  %v1073_v44 = vmax.f32 %v991_v42, 0.0  ;;  %v986_v45 = vadd.f32 %v4299_v50, %v985_v43  ;;  %3390 = vmatprep.mubr.f32.mxu1 %v1070_v41 }
 0x2ed   : > { %v3318_v46 = vpop.f32.mrf.mxu0  ;;  %3391 = vmatmul.mubr.f32.gmra.mxu1 %v1071_v39 }
 0x2ee   : > { %2532 = vst [vmem:[%s4169_s20 + $0x310] sm:$0xff] %v1073_v44  ;;  %v1072_v47 = vmax.f32 %v986_v45, 0.0  ;;  %v1001_v48 = vadd.f32 %v3318_v46, %v4299_v50 }
 0x2ef   : > { %v995_v49 = vpop.f32.mrf.mxu0 }
 0x2f0   : > { %2531 = vst [vmem:[%s4169_s20 + $0x2e8] sm:$0xff] %v1072_v47  ;;  %v1075_v51 = vmax.f32 %v1001_v48, 0.0  ;;  %v996_v52 = vadd.f32 %v4299_v50, %v995_v49  ;;  %3393 = vmatprep.mubr.f32.mxu1 %v1072_v47 }
 0x2f1   : > { %v3321_v53 = vpop.f32.mrf.mxu0  ;;  %3394 = vmatmul.mubr.f32.gmra.mxu1 %v1073_v44 }
 0x2f2   : > { %2534 = vst [vmem:[%s4169_s20 + $0x360] sm:$0xff] %v1075_v51  ;;  %v1074_v15 = vmax.f32 %v996_v52, 0.0  ;;  %v1011_v54 = vadd.f32 %v3321_v53, %v4299_v50 }
 0x2f3   : > { %v1005_v55 = vpop.f32.mrf.mxu0 }
 0x2f4   : > { %2533 = vst [vmem:[%s4169_s20 + $0x338] sm:$0xff] %v1074_v15  ;;  %v1077_v56 = vmax.f32 %v1011_v54, 0.0  ;;  %v1006_v57 = vadd.f32 %v4299_v50, %v1005_v55  ;;  %3396 = vmatprep.mubr.f32.mxu1 %v1074_v15 }
 0x2f5   : > { %v3324_v58 = vpop.f32.mrf.mxu0  ;;  %3397 = vmatmul.mubr.f32.gmra.mxu1 %v1075_v51 }
 0x2f6   : > { %2536 = vst [vmem:[%s4169_s20 + $0x3b0] sm:$0xff] %v1077_v56  ;;  %v1076_v59 = vmax.f32 %v1006_v57, 0.0  ;;  %v1021_v60 = vadd.f32 %v3324_v58, %v4299_v50 }
 0x2f7   : > { %v1015_v61 = vpop.f32.mrf.mxu0 }
 0x2f8   : > { %2535 = vst [vmem:[%s4169_s20 + $0x388] sm:$0xff] %v1076_v59  ;;  %v1079_v62 = vmax.f32 %v1021_v60, 0.0  ;;  %v1016_v63 = vadd.f32 %v4299_v50, %v1015_v61  ;;  %3399 = vmatprep.mubr.f32.mxu1 %v1076_v59 }
 0x2f9   : > { %v3327_v1 = vpop.f32.mrf.mxu0  ;;  %3400 = vmatmul.mubr.f32.gmra.mxu1 %v1077_v56 }
 0x2fa   : > { %2538 = vst [vmem:[%s4169_s20 + $0x400] sm:$0xff] %v1079_v62  ;;  %v1078_v2 = vmax.f32 %v1016_v63, 0.0  ;;  %v1031_v3 = vadd.f32 %v3327_v1, %v4299_v50 }
 0x2fb   : > { %v1025_v4 = vpop.f32.mrf.mxu0 }
 0x2fc   : > { %2537 = vst [vmem:[%s4169_s20 + $0x3d8] sm:$0xff] %v1078_v2  ;;  %v1081_v5 = vmax.f32 %v1031_v3, 0.0  ;;  %v1026_v6 = vadd.f32 %v4299_v50, %v1025_v4  ;;  %3402 = vmatprep.mubr.f32.mxu1 %v1078_v2 }
 0x2fd   : > { %v3330_v7 = vpop.f32.mrf.mxu0  ;;  %3403 = vmatmul.mubr.f32.gmra.mxu1 %v1079_v62 }
 0x2fe   : > { %2540 = vst [vmem:[%s4169_s20 + $0x450] sm:$0xff] %v1081_v5  ;;  %v1080_v8 = vmax.f32 %v1026_v6, 0.0  ;;  %v1041_v9 = vadd.f32 %v3330_v7, %v4299_v50 }
 0x2ff   : > { %v1035_v10 = vpop.f32.mrf.mxu0 }
 0x300   : > { %2539 = vst [vmem:[%s4169_s20 + $0x428] sm:$0xff] %v1080_v8  ;;  %v1083_v11 = vmax.f32 %v1041_v9, 0.0  ;;  %v1036_v12 = vadd.f32 %v4299_v50, %v1035_v10  ;;  %3405 = vmatprep.mubr.f32.mxu1 %v1080_v8 }
 0x301   : > { %v3333_v13 = vpop.f32.mrf.mxu0  ;;  %3406 = vmatmul.mubr.f32.gmra.mxu1 %v1081_v5 }
 0x302   : > { %2542 = vst [vmem:[%s4169_s20 + $0x4a0] sm:$0xff] %v1083_v11  ;;  %v1082_v14 = vmax.f32 %v1036_v12, 0.0  ;;  %v1051_v16 = vadd.f32 %v3333_v13, %v4299_v50 }
 0x303   : > { %v1045_v17 = vpop.f32.mrf.mxu0 }
 0x304   : > { %2541 = vst [vmem:[%s4169_s20 + $0x478] sm:$0xff] %v1082_v14  ;;  %v1085_v18 = vmax.f32 %v1051_v16, 0.0  ;;  %v1046_v19 = vadd.f32 %v4299_v50, %v1045_v17  ;;  %3408 = vmatprep.mubr.f32.mxu1 %v1082_v14  ;;  %v1624_v50 = vld [vmem:[#allocation5 + $0x2d8] sm:$0xff] }
 0x305   : > { %3409 = vmatmul.mubr.f32.gmra.mxu1 %v1083_v11  ;;  %3502 = vmatprep.subr.mxu1 %v1624_v50 }
 0x306   : > { %2544 = vst [vmem:[%s4169_s20 + $0x4f0] sm:$0xff] %v1085_v18  ;;  %v1084_v20 = vmax.f32 %v1046_v19, 0.0  ;;  %3503 = vmatpush3.msra.mxu1 %v1624_v50 }
 0x307   : > { %3504 = vmatprep.subr.mxu1 %v1623_v26 }
 0x308   : > { %2543 = vst [vmem:[%s4169_s20 + $0x4c8] sm:$0xff] %v1084_v20  ;;  %3411 = vmatprep.mubr.f32.mxu1 %v1084_v20  ;;  %3505 = vmatpush3.msra.mxu1 %v1623_v26 }
 0x309   : > { %3412 = vmatmul.mubr.f32.gmra.mxu1 %v1085_v18  ;;  %3506 = vmatprep.subr.mxu1 %v1622_v27 }
 0x30a   : > { %3507 = vmatpush3.msra.mxu1 %v1622_v27 }
 0x30b   : > { %3508 = vmatprep.subr.mxu1 %v1621_v28 }
 0x30c   : > { %3509 = vmatpush3.msra.mxu1 %v1621_v28 }
 0x30d   : > { %3510 = vmatprep.subr.mxu1 %v1620_v29 }
 0x30e   : > { %3511 = vmatpush3.msra.mxu1 %v1620_v29 }
 0x30f   : > { %3512 = vmatprep.subr.mxu1 %v1619_v30 }
 0x310   : > { %3513 = vmatpush3.msra.mxu1 %v1619_v30 }
 0x311   : > { %3514 = vmatprep.subr.mxu1 %v1618_v31 }
 0x312   : > { %3515 = vmatpush3.msra.mxu1 %v1618_v31 }
 0x313   : > { %3516 = vmatprep.subr.mxu1 %v1617_v32 }
 0x314   : > { %3517 = vmatpush3.msra.mxu1 %v1617_v32 }
 0x315   : > { %3518 = vmatprep.subr.mxu1 %v1616_v33 }
 0x316   : > { %3519 = vmatpush3.msra.mxu1 %v1616_v33 }
 0x317   : > { %3520 = vmatprep.subr.mxu1 %v1615_v34 }
 0x318   : > { %3521 = vmatpush3.msra.mxu1 %v1615_v34 }
 0x319   : > { %3522 = vmatprep.subr.mxu1 %v1614_v35 }
 0x31a   : > { %3523 = vmatpush3.msra.mxu1 %v1614_v35 }
 0x38d   : > { %v3368_v37 = vpop.f32.mrf.mxu1 }
 0x38e   : > { %v1180_v38 = vadd.f32 %v3368_v37, %v4365_v36 }
 0x38f   : > { %v1174_v39 = vpop.f32.mrf.mxu1 }
 0x390   : > { %2546 = vst [vmem:[%s4169_s20 + $0x48] sm:$0xff] %v1180_v38  ;;  %v1175_v0 = vadd.f32 %v4365_v36, %v1174_v39  ;;  %v1907_v39 = vld [vmem:[#allocation5 + $0x378] sm:$0xff] }
 0x391   : > { %v3371_v40 = vpop.f32.mrf.mxu1  ;;  %3574 = vmatprep.subr.mxu0 %v1907_v39 }
 0x392   : > { %2545 = vst [vmem:[%s4169_s20 + $0x20] sm:$0xff] %v1175_v0  ;;  %v1190_v41 = vadd.f32 %v3371_v40, %v4365_v36  ;;  %3446 = vmatprep.mubr.f32.mxu0 %v1175_v0  ;;  %v1906_v0 = vld [vmem:[#allocation5 + $0x370] sm:$0xff]  ;;  %v1905_v40 = vld [vmem:[#allocation5 + $0x368] sm:$0xff] }
 0x393   : > { %v1184_v42 = vpop.f32.mrf.mxu1  ;;  %3447 = vmatmul.mubr.f32.vlgmr.msra.gmra.mxu0 %v1180_v38  ;;  %v1613_v38 = vld [vmem:[#allocation5 + $0x280] sm:$0xff] }
 0x394   : > { %2548 = vst [vmem:[%s4169_s20 + $0x98] sm:$0xff] %v1190_v41  ;;  %v1185_v43 = vadd.f32 %v4365_v36, %v1184_v42  ;;  %3524 = vmatprep.subr.mxu1 %v1613_v38  ;;  %3575 = vmatpush3.msra.mxu0 %v1907_v39  ;;  %v1903_v42 = vld [vmem:[#allocation5 + $0x358] sm:$0xff] }
 0x395   : > { %v3374_v44 = vpop.f32.mrf.mxu1  ;;  %3525 = vmatpush3.msra.mxu1 %v1613_v38  ;;  %3576 = vmatprep.subr.mxu0 %v1906_v0 }
 0x396   : > { %2547 = vst [vmem:[%s4169_s20 + $0x70] sm:$0xff] %v1185_v43  ;;  %v1200_v45 = vadd.f32 %v3374_v44, %v4365_v36  ;;  %3449 = vmatprep.mubr.f32.mxu0 %v1185_v43  ;;  %3577 = vmatpush3.msra.mxu0 %v1906_v0  ;;  %v1901_v43 = vld [vmem:[#allocation5 + $0x348] sm:$0xff]  ;;  %v1900_v44 = vld [vmem:[#allocation5 + $0x340] sm:$0xff] }
 0x397   : > { %v1194_v46 = vpop.f32.mrf.mxu1  ;;  %3450 = vmatmul.mubr.f32.gmra.mxu0 %v1190_v41  ;;  %v1904_v41 = vld [vmem:[#allocation5 + $0x360] sm:$0xff]  ;;  %3578 = vmatprep.subr.mxu0 %v1905_v40 }
 0x398   : > { %2550 = vst [vmem:[%s4169_s20 + $0xe8] sm:$0xff] %v1200_v45  ;;  %v1195_v47 = vadd.f32 %v4365_v36, %v1194_v46  ;;  %3579 = vmatpush3.msra.mxu0 %v1905_v40  ;;  %v1898_v46 = vld [vmem:[#allocation5 + $0x330] sm:$0xff] }
 0x399   : > { %v3377_v48 = vpop.f32.mrf.mxu1  ;;  %3580 = vmatprep.subr.mxu0 %v1904_v41 }
 0x39a   : > { %2549 = vst [vmem:[%s4169_s20 + $0xc0] sm:$0xff] %v1195_v47  ;;  %v1210_v49 = vadd.f32 %v3377_v48, %v4365_v36  ;;  %3452 = vmatprep.mubr.f32.mxu0 %v1195_v47  ;;  %3581 = vmatpush3.msra.mxu0 %v1904_v41  ;;  %v1897_v47 = vld [vmem:[#allocation5 + $0x328] sm:$0xff]  ;;  %v1896_v48 = vld [vmem:[#allocation5 + $0x320] sm:$0xff] }
 0x39b   : > { %v1204_v51 = vpop.f32.mrf.mxu1  ;;  %3453 = vmatmul.mubr.f32.gmra.mxu0 %v1200_v45  ;;  %3582 = vmatprep.subr.mxu0 %v1903_v42  ;;  %v1899_v45 = vld [vmem:[#allocation5 + $0x338] sm:$0xff] }
 0x39c   : > { %2552 = vst [vmem:[%s4169_s20 + $0x138] sm:$0xff] %v1210_v49  ;;  %v1205_v52 = vadd.f32 %v4365_v36, %v1204_v51  ;;  %3583 = vmatpush3.msra.mxu0 %v1903_v42  ;;  %v1894_v51 = vld [vmem:[#allocation5 + $0x310] sm:$0xff] }
 0x39d   : > { %v3380_v53 = vpop.f32.mrf.mxu1 }
 0x39e   : > { %2551 = vst [vmem:[%s4169_s20 + $0x110] sm:$0xff] %v1205_v52  ;;  %v1220_v15 = vadd.f32 %v3380_v53, %v4365_v36  ;;  %3455 = vmatprep.mubr.f32.mxu0 %v1205_v52  ;;  %v1893_v52 = vld [vmem:[#allocation5 + $0x308] sm:$0xff]  ;;  %v4431_v53 = vld [vmem:[#allocation7 + $0x4] ss:$0 sm:$0xff] }
 0x39f   : > { %v1214_v54 = vpop.f32.mrf.mxu1  ;;  %3456 = vmatmul.mubr.f32.gmra.mxu0 %v1210_v49  ;;  %v1895_v49 = vld [vmem:[#allocation5 + $0x318] sm:$0xff] }
 0x3a0   : > { %2554 = vst [vmem:[%s4169_s20 + $0x188] sm:$0xff] %v1220_v15  ;;  %v1215_v55 = vadd.f32 %v4365_v36, %v1214_v54 }
 0x3a1   : > { %v3383_v56 = vpop.f32.mrf.mxu1 }
 0x3a2   : > { %2553 = vst [vmem:[%s4169_s20 + $0x160] sm:$0xff] %v1215_v55  ;;  %v1230_v57 = vadd.f32 %v3383_v56, %v4365_v36  ;;  %3458 = vmatprep.mubr.f32.mxu0 %v1215_v55 }
 0x3a3   : > { %v1224_v58 = vpop.f32.mrf.mxu1  ;;  %3459 = vmatmul.mubr.f32.gmra.mxu0 %v1220_v15 }
 0x3a4   : > { %2556 = vst [vmem:[%s4169_s20 + $0x1d8] sm:$0xff] %v1230_v57  ;;  %v1225_v59 = vadd.f32 %v4365_v36, %v1224_v58 }
 0x3a5   : > { %v3386_v60 = vpop.f32.mrf.mxu1 }
 0x3a6   : > { %2555 = vst [vmem:[%s4169_s20 + $0x1b0] sm:$0xff] %v1225_v59  ;;  %v1240_v61 = vadd.f32 %v3386_v60, %v4365_v36  ;;  %3461 = vmatprep.mubr.f32.mxu0 %v1225_v59 }
 0x3a7   : > { %v1234_v62 = vpop.f32.mrf.mxu1  ;;  %3462 = vmatmul.mubr.f32.gmra.mxu0 %v1230_v57 }
 0x3a8   : > { %2558 = vst [vmem:[%s4169_s20 + $0x228] sm:$0xff] %v1240_v61  ;;  %v1235_v63 = vadd.f32 %v4365_v36, %v1234_v62 }
 0x3a9   : > { %v3389_v1 = vpop.f32.mrf.mxu1 }
 0x3aa   : > { %2557 = vst [vmem:[%s4169_s20 + $0x200] sm:$0xff] %v1235_v63  ;;  %v1250_v2 = vadd.f32 %v3389_v1, %v4365_v36  ;;  %3464 = vmatprep.mubr.f32.mxu0 %v1235_v63 }
 0x3ab   : > { %v1244_v3 = vpop.f32.mrf.mxu1  ;;  %3465 = vmatmul.mubr.f32.gmra.mxu0 %v1240_v61 }
 0x3ac   : > { %2560 = vst [vmem:[%s4169_s20 + $0x278] sm:$0xff] %v1250_v2  ;;  %v1245_v4 = vadd.f32 %v4365_v36, %v1244_v3 }
 0x3ad   : > { %v3392_v5 = vpop.f32.mrf.mxu1 }
 0x3ae   : > { %2559 = vst [vmem:[%s4169_s20 + $0x250] sm:$0xff] %v1245_v4  ;;  %v1260_v6 = vadd.f32 %v3392_v5, %v4365_v36  ;;  %3467 = vmatprep.mubr.f32.mxu0 %v1245_v4 }
 0x3af   : > { %v1254_v7 = vpop.f32.mrf.mxu1  ;;  %3468 = vmatmul.mubr.f32.gmra.mxu0 %v1250_v2 }
 0x3b0   : > { %2562 = vst [vmem:[%s4169_s20 + $0x2c8] sm:$0xff] %v1260_v6  ;;  %v1255_v8 = vadd.f32 %v4365_v36, %v1254_v7 }
 0x3b1   : > { %v3395_v9 = vpop.f32.mrf.mxu1 }
 0x3b2   : > { %2561 = vst [vmem:[%s4169_s20 + $0x2a0] sm:$0xff] %v1255_v8  ;;  %v1270_v10 = vadd.f32 %v3395_v9, %v4365_v36  ;;  %3470 = vmatprep.mubr.f32.mxu0 %v1255_v8 }
 0x3b3   : > { %v1264_v11 = vpop.f32.mrf.mxu1  ;;  %3471 = vmatmul.mubr.f32.gmra.mxu0 %v1260_v6 }
 0x3b4   : > { %2564 = vst [vmem:[%s4169_s20 + $0x318] sm:$0xff] %v1270_v10  ;;  %v1265_v12 = vadd.f32 %v4365_v36, %v1264_v11 }
 0x3b5   : > { %v3398_v13 = vpop.f32.mrf.mxu1 }
 0x3b6   : > { %2563 = vst [vmem:[%s4169_s20 + $0x2f0] sm:$0xff] %v1265_v12  ;;  %v1280_v14 = vadd.f32 %v3398_v13, %v4365_v36  ;;  %3473 = vmatprep.mubr.f32.mxu0 %v1265_v12 }
 0x3b7   : > { %v1274_v16 = vpop.f32.mrf.mxu1  ;;  %3474 = vmatmul.mubr.f32.gmra.mxu0 %v1270_v10 }
 0x3b8   : > { %2566 = vst [vmem:[%s4169_s20 + $0x368] sm:$0xff] %v1280_v14  ;;  %v1275_v17 = vadd.f32 %v4365_v36, %v1274_v16 }
 0x3b9   : > { %v3401_v18 = vpop.f32.mrf.mxu1 }
 0x3ba   : > { %2565 = vst [vmem:[%s4169_s20 + $0x340] sm:$0xff] %v1275_v17  ;;  %v1290_v19 = vadd.f32 %v3401_v18, %v4365_v36  ;;  %3476 = vmatprep.mubr.f32.mxu0 %v1275_v17 }
 0x3bb   : > { %v1284_v20 = vpop.f32.mrf.mxu1  ;;  %3477 = vmatmul.mubr.f32.gmra.mxu0 %v1280_v14 }
 0x3bc   : > { %2568 = vst [vmem:[%s4169_s20 + $0x3b8] sm:$0xff] %v1290_v19  ;;  %v1285_v21 = vadd.f32 %v4365_v36, %v1284_v20 }
 0x3bd   : > { %v3404_v22 = vpop.f32.mrf.mxu1 }
 0x3be   : > { %2567 = vst [vmem:[%s4169_s20 + $0x390] sm:$0xff] %v1285_v21  ;;  %v1300_v23 = vadd.f32 %v3404_v22, %v4365_v36  ;;  %3479 = vmatprep.mubr.f32.mxu0 %v1285_v21 }
 0x3bf   : > { %v1294_v24 = vpop.f32.mrf.mxu1  ;;  %3480 = vmatmul.mubr.f32.gmra.mxu0 %v1290_v19 }
 0x3c0   : > { %2570 = vst [vmem:[%s4169_s20 + $0x408] sm:$0xff] %v1300_v23  ;;  %v1295_v25 = vadd.f32 %v4365_v36, %v1294_v24 }
 0x3c1   : > { %v3407_v50 = vpop.f32.mrf.mxu1 }
 0x3c2   : > { %2569 = vst [vmem:[%s4169_s20 + $0x3e0] sm:$0xff] %v1295_v25  ;;  %v1310_v26 = vadd.f32 %v3407_v50, %v4365_v36  ;;  %3482 = vmatprep.mubr.f32.mxu0 %v1295_v25 }
 0x3c3   : > { %v1304_v27 = vpop.f32.mrf.mxu1  ;;  %3483 = vmatmul.mubr.f32.gmra.mxu0 %v1300_v23 }
 0x3c4   : > { %2572 = vst [vmem:[%s4169_s20 + $0x458] sm:$0xff] %v1310_v26  ;;  %v1305_v28 = vadd.f32 %v4365_v36, %v1304_v27 }
 0x3c5   : > { %v3410_v29 = vpop.f32.mrf.mxu1 }
 0x3c6   : > { %2571 = vst [vmem:[%s4169_s20 + $0x430] sm:$0xff] %v1305_v28  ;;  %v1320_v30 = vadd.f32 %v3410_v29, %v4365_v36  ;;  %3485 = vmatprep.mubr.f32.mxu0 %v1305_v28 }
 0x3c7   : > { %v1314_v31 = vpop.f32.mrf.mxu1  ;;  %3486 = vmatmul.mubr.f32.gmra.mxu0 %v1310_v26 }
 0x3c8   : > { %2574 = vst [vmem:[%s4169_s20 + $0x4a8] sm:$0xff] %v1320_v30  ;;  %v1315_v32 = vadd.f32 %v4365_v36, %v1314_v31 }
 0x3c9   : > { %v3413_v33 = vpop.f32.mrf.mxu1 }
 0x3ca   : > { %2573 = vst [vmem:[%s4169_s20 + $0x480] sm:$0xff] %v1315_v32  ;;  %v1330_v34 = vadd.f32 %v3413_v33, %v4365_v36  ;;  %3488 = vmatprep.mubr.f32.mxu0 %v1315_v32 }
 0x3cb   : > { %v1324_v35 = vpop.f32.mrf.mxu1  ;;  %3489 = vmatmul.mubr.f32.gmra.mxu0 %v1320_v30 }
 0x3cc   : > { %2576 = vst [vmem:[%s4169_s20 + $0x4f8] sm:$0xff] %v1330_v34  ;;  %v1325_v37 = vadd.f32 %v4365_v36, %v1324_v35  ;;  %v1902_v36 = vld [vmem:[#allocation5 + $0x350] sm:$0xff] }
 0x3cd   : > { %3584 = vmatprep.subr.mxu0 %v1902_v36 }
 0x3ce   : > { %2575 = vst [vmem:[%s4169_s20 + $0x4d0] sm:$0xff] %v1325_v37  ;;  %3491 = vmatprep.mubr.f32.mxu0 %v1325_v37  ;;  %3585 = vmatpush3.msra.mxu0 %v1902_v36 }
 0x3cf   : > { %3492 = vmatmul.mubr.f32.gmra.mxu0 %v1330_v34  ;;  %3586 = vmatprep.subr.mxu0 %v1901_v43 }
 0x3d0   : > { %3587 = vmatpush3.msra.mxu0 %v1901_v43 }
 0x3d1   : > { %3588 = vmatprep.subr.mxu0 %v1900_v44 }
 0x3d2   : > { %3589 = vmatpush3.msra.mxu0 %v1900_v44 }
 0x3d3   : > { %3590 = vmatprep.subr.mxu0 %v1899_v45 }
 0x3d4   : > { %3591 = vmatpush3.msra.mxu0 %v1899_v45 }
 0x3d5   : > { %3592 = vmatprep.subr.mxu0 %v1898_v46 }
 0x3d6   : > { %3593 = vmatpush3.msra.mxu0 %v1898_v46 }
 0x3d7   : > { %3594 = vmatprep.subr.mxu0 %v1897_v47 }
 0x3d8   : > { %3595 = vmatpush3.msra.mxu0 %v1897_v47 }
 0x3d9   : > { %3596 = vmatprep.subr.mxu0 %v1896_v48 }
 0x3da   : > { %3597 = vmatpush3.msra.mxu0 %v1896_v48 }
 0x3db   : > { %3598 = vmatprep.subr.mxu0 %v1895_v49 }
 0x3dc   : > { %3599 = vmatpush3.msra.mxu0 %v1895_v49 }
 0x3dd   : > { %3600 = vmatprep.subr.mxu0 %v1894_v51 }
 0x3de   : > { %3601 = vmatpush3.msra.mxu0 %v1894_v51 }
 0x3df   : > { %3602 = vmatprep.subr.mxu0 %v1893_v52 }
 0x3e0   : > { %3603 = vmatpush3.msra.mxu0 %v1893_v52 }
 0x453   : > { %v3448_v15 = vpop.f32.mrf.mxu0 }
 0x454   : > { %v1427_v54 = vadd.f32 %v3448_v15, %v4431_v53 }
 0x455   : > { %v1421_v55 = vpop.f32.mrf.mxu0 }
 0x456   : > { %v1422_v56 = vadd.f32 %v4431_v53, %v1421_v55  ;;  %v1581_v59 = vmax.f32 %v1427_v54, 0.0 }
 0x457   : > { %v3451_v57 = vpop.f32.mrf.mxu0 }
 0x458   : > { %v1580_v58 = vmax.f32 %v1422_v56, 0.0  ;;  %v1437_v60 = vadd.f32 %v3451_v57, %v4431_v53 }
 0x459   : > { %v1431_v61 = vpop.f32.mrf.mxu0 }
 0x45a   : > { %v1432_v62 = vadd.f32 %v4431_v53, %v1431_v61  ;;  %3526 = vmatprep.mubr.f32.mxu1 %v1580_v58  ;;  %v1583_v2 = vmax.f32 %v1437_v60, 0.0 }
 0x45b   : > { %v3454_v63 = vpop.f32.mrf.mxu0  ;;  %3527 = vmatmul.mubr.f32.vlgmr.msra.gmra.mxu1 %v1581_v59 }
 0x45c   : > { %v1582_v1 = vmax.f32 %v1432_v62, 0.0  ;;  %v1447_v3 = vadd.f32 %v3454_v63, %v4431_v53 }
 0x45d   : > { %v1441_v4 = vpop.f32.mrf.mxu0 }
 0x45e   : > { %v1442_v5 = vadd.f32 %v4431_v53, %v1441_v4  ;;  %3529 = vmatprep.mubr.f32.mxu1 %v1582_v1  ;;  %v1585_v8 = vmax.f32 %v1447_v3, 0.0 }
 0x45f   : > { %v3457_v6 = vpop.f32.mrf.mxu0  ;;  %3530 = vmatmul.mubr.f32.gmra.mxu1 %v1583_v2 }
 0x460   : > { %v1584_v7 = vmax.f32 %v1442_v5, 0.0  ;;  %v1457_v9 = vadd.f32 %v3457_v6, %v4431_v53 }
 0x461   : > { %v1451_v10 = vpop.f32.mrf.mxu0 }
 0x462   : > { %v1452_v11 = vadd.f32 %v4431_v53, %v1451_v10  ;;  %3532 = vmatprep.mubr.f32.mxu1 %v1584_v7  ;;  %v1587_v14 = vmax.f32 %v1457_v9, 0.0 }
 0x463   : > { %v3460_v12 = vpop.f32.mrf.mxu0  ;;  %3533 = vmatmul.mubr.f32.gmra.mxu1 %v1585_v8 }
 0x464   : > { %v1586_v13 = vmax.f32 %v1452_v11, 0.0  ;;  %v1467_v16 = vadd.f32 %v3460_v12, %v4431_v53 }
 0x465   : > { %v1461_v17 = vpop.f32.mrf.mxu0 }
 0x466   : > { %v1462_v18 = vadd.f32 %v4431_v53, %v1461_v17  ;;  %3535 = vmatprep.mubr.f32.mxu1 %v1586_v13  ;;  %v1589_v21 = vmax.f32 %v1467_v16, 0.0 }
 0x467   : > { %v3463_v19 = vpop.f32.mrf.mxu0  ;;  %3536 = vmatmul.mubr.f32.gmra.mxu1 %v1587_v14 }
 0x468   : > { %v1588_v20 = vmax.f32 %v1462_v18, 0.0  ;;  %v1477_v22 = vadd.f32 %v3463_v19, %v4431_v53 }
 0x469   : > { %v1471_v23 = vpop.f32.mrf.mxu0 }
 0x46a   : > { %v1472_v24 = vadd.f32 %v4431_v53, %v1471_v23  ;;  %3538 = vmatprep.mubr.f32.mxu1 %v1588_v20  ;;  %v1591_v26 = vmax.f32 %v1477_v22, 0.0 }
 0x46b   : > { %v3466_v25 = vpop.f32.mrf.mxu0  ;;  %3539 = vmatmul.mubr.f32.gmra.mxu1 %v1589_v21 }
 0x46c   : > { %v1590_v50 = vmax.f32 %v1472_v24, 0.0  ;;  %v1487_v27 = vadd.f32 %v3466_v25, %v4431_v53  ;;  %v1892_v24 = vld [vmem:[#allocation5 + $0x300] sm:$0xff]  ;;  %v2186_v25 = vld [vmem:[#allocation5 + $0x3f8] sm:$0xff] }
 0x46d   : > { %v1481_v28 = vpop.f32.mrf.mxu0  ;;  %3604 = vmatprep.subr.mxu0 %v1892_v24  ;;  %3654 = vmatprep.subr.mxu1 %v2186_v25 }
 0x46e   : > { %v1482_v29 = vadd.f32 %v4431_v53, %v1481_v28  ;;  %3541 = vmatprep.mubr.f32.mxu1 %v1590_v50  ;;  %v1593_v32 = vmax.f32 %v1487_v27, 0.0  ;;  %3605 = vmatpush3.msra.mxu0 %v1892_v24  ;;  %v2185_v50 = vld [vmem:[#allocation5 + $0x3f0] sm:$0xff]  ;;  %v2183_v27 = vld [vmem:[#allocation5 + $0x3e0] sm:$0xff] }
 0x46f   : > { %v3469_v30 = vpop.f32.mrf.mxu0  ;;  %3542 = vmatmul.mubr.f32.gmra.mxu1 %v1591_v26  ;;  %v2184_v26 = vld [vmem:[#allocation5 + $0x3e8] sm:$0xff]  ;;  %v2181_v28 = vld [vmem:[#allocation5 + $0x3d0] sm:$0xff] }
 0x470   : > { %v1592_v31 = vmax.f32 %v1482_v29, 0.0  ;;  %v1497_v33 = vadd.f32 %v3469_v30, %v4431_v53  ;;  %3655 = vmatpush3.msra.mxu1 %v2186_v25  ;;  %v2180_v29 = vld [vmem:[#allocation5 + $0x3c8] sm:$0xff]  ;;  %v2179_v30 = vld [vmem:[#allocation5 + $0x3c0] sm:$0xff] }
 0x471   : > { %v1491_v34 = vpop.f32.mrf.mxu0  ;;  %3656 = vmatprep.subr.mxu1 %v2185_v50 }
 0x472   : > { %v1492_v35 = vadd.f32 %v4431_v53, %v1491_v34  ;;  %3544 = vmatprep.mubr.f32.mxu1 %v1592_v31  ;;  %v1595_v39 = vmax.f32 %v1497_v33, 0.0  ;;  %3657 = vmatpush3.msra.mxu1 %v2185_v50  ;;  %v2178_v31 = vld [vmem:[#allocation5 + $0x3b8] sm:$0xff]  ;;  %v2176_v33 = vld [vmem:[#allocation5 + $0x3a8] sm:$0xff]  ;;  %v2175_v34 = vld [vmem:[#allocation5 + $0x3a0] sm:$0xff] }
 0x473   : > { %v3472_v37 = vpop.f32.mrf.mxu0  ;;  %3545 = vmatmul.mubr.f32.gmra.mxu1 %v1593_v32  ;;  %3658 = vmatprep.subr.mxu1 %v2184_v26  ;;  %v2177_v32 = vld [vmem:[#allocation5 + $0x3b0] sm:$0xff] }
 0x474   : > { %v1594_v38 = vmax.f32 %v1492_v35, 0.0  ;;  %v1507_v0 = vadd.f32 %v3472_v37, %v4431_v53  ;;  %3659 = vmatpush3.msra.mxu1 %v2184_v26  ;;  %v2174_v35 = vld [vmem:[#allocation5 + $0x398] sm:$0xff]  ;;  %v2173_v37 = vld [vmem:[#allocation5 + $0x390] sm:$0xff] }
 0x475   : > { %v1501_v40 = vpop.f32.mrf.mxu0  ;;  %3660 = vmatprep.subr.mxu1 %v2183_v27 }
 0x476   : > { %v1502_v41 = vadd.f32 %v4431_v53, %v1501_v40  ;;  %3547 = vmatprep.mubr.f32.mxu1 %v1594_v38  ;;  %v1597_v43 = vmax.f32 %v1507_v0, 0.0  ;;  %3661 = vmatpush3.msra.mxu1 %v2183_v27  ;;  %v2172_v38 = vld [vmem:[#allocation5 + $0x388] sm:$0xff] }
 0x477   : > { %v3475_v42 = vpop.f32.mrf.mxu0  ;;  %3548 = vmatmul.mubr.f32.gmra.mxu1 %v1595_v39  ;;  %v4465_v39 = vld [vmem:[#allocation7 + $0x5] ss:$0 sm:$0xff] }
 0x478   : > { %v1596_v36 = vmax.f32 %v1502_v41, 0.0  ;;  %v1517_v44 = vadd.f32 %v3475_v42, %v4431_v53 }
 0x479   : > { %v1511_v45 = vpop.f32.mrf.mxu0 }
 0x47a   : > { %v1512_v46 = vadd.f32 %v4431_v53, %v1511_v45  ;;  %3550 = vmatprep.mubr.f32.mxu1 %v1596_v36  ;;  %v1599_v49 = vmax.f32 %v1517_v44, 0.0 }
 0x47b   : > { %v3478_v47 = vpop.f32.mrf.mxu0  ;;  %3551 = vmatmul.mubr.f32.gmra.mxu1 %v1597_v43 }
 0x47c   : > { %v1598_v48 = vmax.f32 %v1512_v46, 0.0  ;;  %v1527_v51 = vadd.f32 %v3478_v47, %v4431_v53 }
 0x47d   : > { %v1521_v52 = vpop.f32.mrf.mxu0 }
 0x47e   : > { %v1522_v15 = vadd.f32 %v4431_v53, %v1521_v52  ;;  %3553 = vmatprep.mubr.f32.mxu1 %v1598_v48  ;;  %v1601_v56 = vmax.f32 %v1527_v51, 0.0 }
 0x47f   : > { %v3481_v54 = vpop.f32.mrf.mxu0  ;;  %3554 = vmatmul.mubr.f32.gmra.mxu1 %v1599_v49 }
 0x480   : > { %v1600_v55 = vmax.f32 %v1522_v15, 0.0  ;;  %v1537_v57 = vadd.f32 %v3481_v54, %v4431_v53 }
 0x481   : > { %v1531_v58 = vpop.f32.mrf.mxu0 }
 0x482   : > { %v1532_v59 = vadd.f32 %v4431_v53, %v1531_v58  ;;  %3556 = vmatprep.mubr.f32.mxu1 %v1600_v55  ;;  %v1603_v62 = vmax.f32 %v1537_v57, 0.0 }
 0x483   : > { %v3484_v60 = vpop.f32.mrf.mxu0  ;;  %3557 = vmatmul.mubr.f32.gmra.mxu1 %v1601_v56 }
 0x484   : > { %v1602_v61 = vmax.f32 %v1532_v59, 0.0  ;;  %v1547_v63 = vadd.f32 %v3484_v60, %v4431_v53 }
 0x485   : > { %v1541_v1 = vpop.f32.mrf.mxu0 }
 0x486   : > { %v1542_v2 = vadd.f32 %v4431_v53, %v1541_v1  ;;  %3559 = vmatprep.mubr.f32.mxu1 %v1602_v61  ;;  %v1605_v5 = vmax.f32 %v1547_v63, 0.0 }
 0x487   : > { %v3487_v3 = vpop.f32.mrf.mxu0  ;;  %3560 = vmatmul.mubr.f32.gmra.mxu1 %v1603_v62 }
 0x488   : > { %v1604_v4 = vmax.f32 %v1542_v2, 0.0  ;;  %v1557_v6 = vadd.f32 %v3487_v3, %v4431_v53 }
 0x489   : > { %v1551_v7 = vpop.f32.mrf.mxu0 }
 0x48a   : > { %v1552_v8 = vadd.f32 %v4431_v53, %v1551_v7  ;;  %3562 = vmatprep.mubr.f32.mxu1 %v1604_v4  ;;  %v1607_v11 = vmax.f32 %v1557_v6, 0.0 }
 0x48b   : > { %v3490_v9 = vpop.f32.mrf.mxu0  ;;  %3563 = vmatmul.mubr.f32.gmra.mxu1 %v1605_v5 }
 0x48c   : > { %v1606_v10 = vmax.f32 %v1552_v8, 0.0  ;;  %v1567_v12 = vadd.f32 %v3490_v9, %v4431_v53 }
 0x48d   : > { %v1561_v13 = vpop.f32.mrf.mxu0 }
 0x48e   : > { %v1562_v14 = vadd.f32 %v4431_v53, %v1561_v13  ;;  %3565 = vmatprep.mubr.f32.mxu1 %v1606_v10  ;;  %v1609_v18 = vmax.f32 %v1567_v12, 0.0 }
 0x48f   : > { %v3493_v16 = vpop.f32.mrf.mxu0  ;;  %3566 = vmatmul.mubr.f32.gmra.mxu1 %v1607_v11 }
 0x490   : > { %v1608_v17 = vmax.f32 %v1562_v14, 0.0  ;;  %v1577_v19 = vadd.f32 %v3493_v16, %v4431_v53 }
 0x491   : > { %v1571_v20 = vpop.f32.mrf.mxu0 }
 0x492   : > { %v1572_v21 = vadd.f32 %v4431_v53, %v1571_v20  ;;  %3568 = vmatprep.mubr.f32.mxu1 %v1608_v17  ;;  %v1611_v23 = vmax.f32 %v1577_v19, 0.0  ;;  %v2182_v53 = vld [vmem:[#allocation5 + $0x3d8] sm:$0xff] }
 0x493   : > { %3569 = vmatmul.mubr.f32.gmra.mxu1 %v1609_v18  ;;  %3662 = vmatprep.subr.mxu1 %v2182_v53 }
 0x494   : > { %v1610_v22 = vmax.f32 %v1572_v21, 0.0  ;;  %3663 = vmatpush3.msra.mxu1 %v2182_v53 }
 0x495   : > { %3664 = vmatprep.subr.mxu1 %v2181_v28 }
 0x496   : > { %3571 = vmatprep.mubr.f32.mxu1 %v1610_v22  ;;  %3665 = vmatpush3.msra.mxu1 %v2181_v28 }
 0x497   : > { %3572 = vmatmul.mubr.f32.gmra.mxu1 %v1611_v23  ;;  %3666 = vmatprep.subr.mxu1 %v2180_v29 }
 0x498   : > { %3667 = vmatpush3.msra.mxu1 %v2180_v29 }
 0x499   : > { %3668 = vmatprep.subr.mxu1 %v2179_v30 }
 0x49a   : > { %3669 = vmatpush3.msra.mxu1 %v2179_v30 }
 0x49b   : > { %3670 = vmatprep.subr.mxu1 %v2178_v31 }
 0x49c   : > { %3671 = vmatpush3.msra.mxu1 %v2178_v31 }
 0x49d   : > { %3672 = vmatprep.subr.mxu1 %v2177_v32 }
 0x49e   : > { %3673 = vmatpush3.msra.mxu1 %v2177_v32 }
 0x49f   : > { %3674 = vmatprep.subr.mxu1 %v2176_v33 }
 0x4a0   : > { %3675 = vmatpush3.msra.mxu1 %v2176_v33 }
 0x4a1   : > { %3676 = vmatprep.subr.mxu1 %v2175_v34 }
 0x4a2   : > { %3677 = vmatpush3.msra.mxu1 %v2175_v34 }
 0x4a3   : > { %3678 = vmatprep.subr.mxu1 %v2174_v35 }
 0x4a4   : > { %3679 = vmatpush3.msra.mxu1 %v2174_v35 }
 0x4a5   : > { %3680 = vmatprep.subr.mxu1 %v2173_v37 }
 0x4a6   : > { %3681 = vmatpush3.msra.mxu1 %v2173_v37 }
 0x4a7   : > { %3682 = vmatprep.subr.mxu1 %v2172_v38 }
 0x4a8   : > { %3683 = vmatpush3.msra.mxu1 %v2172_v38 }
 0x51b   : > { %v3528_v0 = vpop.f32.mrf.mxu1 }
 0x51c   : > { %v1706_v40 = vadd.f32 %v3528_v0, %v4465_v39 }
 0x51d   : > { %v1700_v41 = vpop.f32.mrf.mxu1 }
 0x51e   : > { %v1701_v42 = vadd.f32 %v4465_v39, %v1700_v41  ;;  %v1860_v44 = vmax.f32 %v1706_v40, 0.0 }
 0x51f   : > { %v3531_v36 = vpop.f32.mrf.mxu1 }
 0x520   : > { %v1859_v43 = vmax.f32 %v1701_v42, 0.0  ;;  %v1716_v45 = vadd.f32 %v3531_v36, %v4465_v39 }
 0x521   : > { %v1710_v46 = vpop.f32.mrf.mxu1 }
 0x522   : > { %v1711_v47 = vadd.f32 %v4465_v39, %v1710_v46  ;;  %3606 = vmatprep.mubr.f32.mxu0 %v1859_v43  ;;  %v1862_v51 = vmax.f32 %v1716_v45, 0.0 }
 0x523   : > { %v3534_v48 = vpop.f32.mrf.mxu1  ;;  %3607 = vmatmul.mubr.f32.vlgmr.msra.gmra.mxu0 %v1860_v44 }
 0x524   : > { %v1861_v49 = vmax.f32 %v1711_v47, 0.0  ;;  %v1726_v52 = vadd.f32 %v3534_v48, %v4465_v39 }
 0x525   : > { %v1720_v15 = vpop.f32.mrf.mxu1 }
 0x526   : > { %v1721_v54 = vadd.f32 %v4465_v39, %v1720_v15  ;;  %3609 = vmatprep.mubr.f32.mxu0 %v1861_v49  ;;  %v1864_v57 = vmax.f32 %v1726_v52, 0.0 }
 0x527   : > { %v3537_v55 = vpop.f32.mrf.mxu1  ;;  %3610 = vmatmul.mubr.f32.gmra.mxu0 %v1862_v51 }
 0x528   : > { %v1863_v56 = vmax.f32 %v1721_v54, 0.0  ;;  %v1736_v58 = vadd.f32 %v3537_v55, %v4465_v39 }
 0x529   : > { %v1730_v59 = vpop.f32.mrf.mxu1 }
 0x52a   : > { %v1731_v60 = vadd.f32 %v4465_v39, %v1730_v59  ;;  %3612 = vmatprep.mubr.f32.mxu0 %v1863_v56  ;;  %v1866_v63 = vmax.f32 %v1736_v58, 0.0 }
 0x52b   : > { %v3540_v61 = vpop.f32.mrf.mxu1  ;;  %3613 = vmatmul.mubr.f32.gmra.mxu0 %v1864_v57 }
 0x52c   : > { %v1865_v62 = vmax.f32 %v1731_v60, 0.0  ;;  %v1746_v1 = vadd.f32 %v3540_v61, %v4465_v39 }
 0x52d   : > { %v1740_v2 = vpop.f32.mrf.mxu1 }
 0x52e   : > { %v1741_v3 = vadd.f32 %v4465_v39, %v1740_v2  ;;  %3615 = vmatprep.mubr.f32.mxu0 %v1865_v62  ;;  %v1868_v6 = vmax.f32 %v1746_v1, 0.0 }
 0x52f   : > { %v3543_v4 = vpop.f32.mrf.mxu1  ;;  %3616 = vmatmul.mubr.f32.gmra.mxu0 %v1866_v63 }
 0x530   : > { %v1867_v5 = vmax.f32 %v1741_v3, 0.0  ;;  %v1756_v7 = vadd.f32 %v3543_v4, %v4465_v39 }
 0x531   : > { %v1750_v8 = vpop.f32.mrf.mxu1 }
 0x532   : > { %v1751_v9 = vadd.f32 %v4465_v39, %v1750_v8  ;;  %3618 = vmatprep.mubr.f32.mxu0 %v1867_v5  ;;  %v1870_v12 = vmax.f32 %v1756_v7, 0.0 }
 0x533   : > { %v3546_v10 = vpop.f32.mrf.mxu1  ;;  %3619 = vmatmul.mubr.f32.gmra.mxu0 %v1868_v6 }
 0x534   : > { %v1869_v11 = vmax.f32 %v1751_v9, 0.0  ;;  %v1766_v13 = vadd.f32 %v3546_v10, %v4465_v39  ;;  %v2171_v9 = vld [vmem:[#allocation5 + $0x380] sm:$0xff] }
 0x535   : > { %v1760_v14 = vpop.f32.mrf.mxu1  ;;  %3684 = vmatprep.subr.mxu1 %v2171_v9  ;;  %v4499_v10 = vld [vmem:[#allocation7 + $0x6] ss:$0 sm:$0xff] }
 0x536   : > { %v1761_v16 = vadd.f32 %v4465_v39, %v1760_v14  ;;  %3621 = vmatprep.mubr.f32.mxu0 %v1869_v11  ;;  %v1872_v19 = vmax.f32 %v1766_v13, 0.0  ;;  %3685 = vmatpush3.msra.mxu1 %v2171_v9 }
 0x537   : > { %v3549_v17 = vpop.f32.mrf.mxu1  ;;  %3622 = vmatmul.mubr.f32.gmra.mxu0 %v1870_v12 }
 0x538   : > { %v1871_v18 = vmax.f32 %v1761_v16, 0.0  ;;  %v1776_v20 = vadd.f32 %v3549_v17, %v4465_v39 }
 0x539   : > { %v1770_v21 = vpop.f32.mrf.mxu1 }
 0x53a   : > { %v1771_v22 = vadd.f32 %v4465_v39, %v1770_v21  ;;  %3624 = vmatprep.mubr.f32.mxu0 %v1871_v18  ;;  %v1874_v25 = vmax.f32 %v1776_v20, 0.0 }
 0x53b   : > { %v3552_v23 = vpop.f32.mrf.mxu1  ;;  %3625 = vmatmul.mubr.f32.gmra.mxu0 %v1872_v19 }
 0x53c   : > { %v1873_v24 = vmax.f32 %v1771_v22, 0.0  ;;  %v1786_v50 = vadd.f32 %v3552_v23, %v4465_v39 }
 0x53d   : > { %v1780_v26 = vpop.f32.mrf.mxu1 }
 0x53e   : > { %v1781_v27 = vadd.f32 %v4465_v39, %v1780_v26  ;;  %3627 = vmatprep.mubr.f32.mxu0 %v1873_v24  ;;  %v1876_v29 = vmax.f32 %v1786_v50, 0.0 }
 0x53f   : > { %v3555_v53 = vpop.f32.mrf.mxu1  ;;  %3628 = vmatmul.mubr.f32.gmra.mxu0 %v1874_v25 }
 0x540   : > { %v1875_v28 = vmax.f32 %v1781_v27, 0.0  ;;  %v1796_v30 = vadd.f32 %v3555_v53, %v4465_v39 }
 0x541   : > { %v1790_v31 = vpop.f32.mrf.mxu1 }
 0x542   : > { %v1791_v32 = vadd.f32 %v4465_v39, %v1790_v31  ;;  %3630 = vmatprep.mubr.f32.mxu0 %v1875_v28  ;;  %v1878_v35 = vmax.f32 %v1796_v30, 0.0 }
 0x543   : > { %v3558_v33 = vpop.f32.mrf.mxu1  ;;  %3631 = vmatmul.mubr.f32.gmra.mxu0 %v1876_v29 }
 0x544   : > { %v1877_v34 = vmax.f32 %v1791_v32, 0.0  ;;  %v1806_v37 = vadd.f32 %v3558_v33, %v4465_v39 }
 0x545   : > { %v1800_v38 = vpop.f32.mrf.mxu1 }
 0x546   : > { %v1801_v0 = vadd.f32 %v4465_v39, %v1800_v38  ;;  %3633 = vmatprep.mubr.f32.mxu0 %v1877_v34  ;;  %v1880_v42 = vmax.f32 %v1806_v37, 0.0 }
 0x547   : > { %v3561_v40 = vpop.f32.mrf.mxu1  ;;  %3634 = vmatmul.mubr.f32.gmra.mxu0 %v1878_v35 }
 0x548   : > { %v1879_v41 = vmax.f32 %v1801_v0, 0.0  ;;  %v1816_v36 = vadd.f32 %v3561_v40, %v4465_v39 }
 0x549   : > { %v1810_v43 = vpop.f32.mrf.mxu1 }
 0x54a   : > { %v1811_v44 = vadd.f32 %v4465_v39, %v1810_v43  ;;  %3636 = vmatprep.mubr.f32.mxu0 %v1879_v41  ;;  %v1882_v47 = vmax.f32 %v1816_v36, 0.0 }
 0x54b   : > { %v3564_v45 = vpop.f32.mrf.mxu1  ;;  %3637 = vmatmul.mubr.f32.gmra.mxu0 %v1880_v42 }
 0x54c   : > { %v1881_v46 = vmax.f32 %v1811_v44, 0.0  ;;  %v1826_v48 = vadd.f32 %v3564_v45, %v4465_v39 }
 0x54d   : > { %v1820_v49 = vpop.f32.mrf.mxu1 }
 0x54e   : > { %v1821_v51 = vadd.f32 %v4465_v39, %v1820_v49  ;;  %3639 = vmatprep.mubr.f32.mxu0 %v1881_v46  ;;  %v1884_v54 = vmax.f32 %v1826_v48, 0.0 }
 0x54f   : > { %v3567_v52 = vpop.f32.mrf.mxu1  ;;  %3640 = vmatmul.mubr.f32.gmra.mxu0 %v1882_v47 }
 0x550   : > { %v1883_v15 = vmax.f32 %v1821_v51, 0.0  ;;  %v1836_v55 = vadd.f32 %v3567_v52, %v4465_v39 }
 0x551   : > { %v1830_v56 = vpop.f32.mrf.mxu1 }
 0x552   : > { %v1831_v57 = vadd.f32 %v4465_v39, %v1830_v56  ;;  %3642 = vmatprep.mubr.f32.mxu0 %v1883_v15  ;;  %v1886_v60 = vmax.f32 %v1836_v55, 0.0 }
 0x553   : > { %v3570_v58 = vpop.f32.mrf.mxu1  ;;  %3643 = vmatmul.mubr.f32.gmra.mxu0 %v1884_v54 }
 0x554   : > { %v1885_v59 = vmax.f32 %v1831_v57, 0.0  ;;  %v1846_v61 = vadd.f32 %v3570_v58, %v4465_v39 }
 0x555   : > { %v1840_v62 = vpop.f32.mrf.mxu1 }
 0x556   : > { %v1841_v63 = vadd.f32 %v4465_v39, %v1840_v62  ;;  %3645 = vmatprep.mubr.f32.mxu0 %v1885_v59  ;;  %v1888_v3 = vmax.f32 %v1846_v61, 0.0 }
 0x557   : > { %v3573_v1 = vpop.f32.mrf.mxu1  ;;  %3646 = vmatmul.mubr.f32.gmra.mxu0 %v1886_v60 }
 0x558   : > { %v1887_v2 = vmax.f32 %v1841_v63, 0.0  ;;  %v1856_v4 = vadd.f32 %v3573_v1, %v4465_v39 }
 0x559   : > { %v1850_v5 = vpop.f32.mrf.mxu1 }
 0x55a   : > { %v1851_v6 = vadd.f32 %v4465_v39, %v1850_v5  ;;  %3648 = vmatprep.mubr.f32.mxu0 %v1887_v2  ;;  %v1890_v8 = vmax.f32 %v1856_v4, 0.0 }
 0x55b   : > { %3649 = vmatmul.mubr.f32.gmra.mxu0 %v1888_v3 }
 0x55c   : > { %v1889_v7 = vmax.f32 %v1851_v6, 0.0 }
 0x55e   : > { %3651 = vmatprep.mubr.f32.mxu0 %v1889_v7 }
 0x55f   : > { %3652 = vmatmul.mubr.f32.gmra.mxu0 %v1890_v8 }
 0x5e3   : > { %v3608_v11 = vpop.f32.mrf.mxu0 }
 0x5e4   : > { %v1985_v12 = vadd.f32 %v3608_v11, %v4499_v10 }
 0x5e5   : > { %v1979_v13 = vpop.f32.mrf.mxu0 }
 0x5e6   : > { %v1980_v14 = vadd.f32 %v4499_v10, %v1979_v13  ;;  %v2139_v39 = vmax.f32 %v1985_v12, 0.0 }
 0x5e7   : > { %v3611_v16 = vpop.f32.mrf.mxu0 }
 0x5e8   : > { %v2138_v17 = vmax.f32 %v1980_v14, 0.0  ;;  %v1995_v18 = vadd.f32 %v3611_v16, %v4499_v10 }
 0x5e9   : > { %v1989_v19 = vpop.f32.mrf.mxu0 }
 0x5ea   : > { %v1990_v20 = vadd.f32 %v4499_v10, %v1989_v19  ;;  %3686 = vmatprep.mubr.f32.mxu1 %v2138_v17  ;;  %v2141_v23 = vmax.f32 %v1995_v18, 0.0 }
 0x5eb   : > { %v3614_v21 = vpop.f32.mrf.mxu0  ;;  %3687 = vmatmul.mubr.f32.vlgmr.msra.gmra.mxu1 %v2139_v39 }
 0x5ec   : > { %v2140_v22 = vmax.f32 %v1990_v20, 0.0  ;;  %v2005_v24 = vadd.f32 %v3614_v21, %v4499_v10 }
 0x5ed   : > { %v1999_v25 = vpop.f32.mrf.mxu0 }
 0x5ee   : > { %v2000_v50 = vadd.f32 %v4499_v10, %v1999_v25  ;;  %3689 = vmatprep.mubr.f32.mxu1 %v2140_v22  ;;  %v2143_v53 = vmax.f32 %v2005_v24, 0.0 }
 0x5ef   : > { %v3617_v26 = vpop.f32.mrf.mxu0  ;;  %3690 = vmatmul.mubr.f32.gmra.mxu1 %v2141_v23 }
 0x5f0   : > { %v2142_v27 = vmax.f32 %v2000_v50, 0.0  ;;  %v2015_v28 = vadd.f32 %v3617_v26, %v4499_v10 }
 0x5f1   : > { %v2009_v29 = vpop.f32.mrf.mxu0 }
 0x5f2   : > { %v2010_v30 = vadd.f32 %v4499_v10, %v2009_v29  ;;  %3692 = vmatprep.mubr.f32.mxu1 %v2142_v27  ;;  %v2145_v33 = vmax.f32 %v2015_v28, 0.0 }
 0x5f3   : > { %v3620_v31 = vpop.f32.mrf.mxu0  ;;  %3693 = vmatmul.mubr.f32.gmra.mxu1 %v2143_v53 }
 0x5f4   : > { %v2144_v32 = vmax.f32 %v2010_v30, 0.0  ;;  %v2025_v34 = vadd.f32 %v3620_v31, %v4499_v10 }
 0x5f5   : > { %v2019_v35 = vpop.f32.mrf.mxu0 }
 0x5f6   : > { %v2020_v37 = vadd.f32 %v4499_v10, %v2019_v35  ;;  %3695 = vmatprep.mubr.f32.mxu1 %v2144_v32  ;;  %v2147_v40 = vmax.f32 %v2025_v34, 0.0 }
 0x5f7   : > { %v3623_v38 = vpop.f32.mrf.mxu0  ;;  %3696 = vmatmul.mubr.f32.gmra.mxu1 %v2145_v33 }
 0x5f8   : > { %v2146_v0 = vmax.f32 %v2020_v37, 0.0  ;;  %v2035_v41 = vadd.f32 %v3623_v38, %v4499_v10 }
 0x5f9   : > { %v2029_v42 = vpop.f32.mrf.mxu0 }
 0x5fa   : > { %v2030_v36 = vadd.f32 %v4499_v10, %v2029_v42  ;;  %3698 = vmatprep.mubr.f32.mxu1 %v2146_v0  ;;  %v2149_v45 = vmax.f32 %v2035_v41, 0.0 }
 0x5fb   : > { %v3626_v43 = vpop.f32.mrf.mxu0  ;;  %3699 = vmatmul.mubr.f32.gmra.mxu1 %v2147_v40 }
 0x5fc   : > { %v2148_v44 = vmax.f32 %v2030_v36, 0.0  ;;  %v2045_v46 = vadd.f32 %v3626_v43, %v4499_v10  ;;  %v4533_v36 = vld [vmem:[#allocation7 + $0x7] ss:$0 sm:$0xff] }
 0x5fd   : > { %v2039_v47 = vpop.f32.mrf.mxu0 }
 0x5fe   : > { %v2040_v48 = vadd.f32 %v4499_v10, %v2039_v47  ;;  %3701 = vmatprep.mubr.f32.mxu1 %v2148_v44  ;;  %v2151_v52 = vmax.f32 %v2045_v46, 0.0 }
 0x5ff   : > { %v3629_v49 = vpop.f32.mrf.mxu0  ;;  %3702 = vmatmul.mubr.f32.gmra.mxu1 %v2149_v45 }
 0x600   : > { %v2150_v51 = vmax.f32 %v2040_v48, 0.0  ;;  %v2055_v15 = vadd.f32 %v3629_v49, %v4499_v10 }
 0x601   : > { %v2049_v54 = vpop.f32.mrf.mxu0 }
 0x602   : > { %v2050_v55 = vadd.f32 %v4499_v10, %v2049_v54  ;;  %3704 = vmatprep.mubr.f32.mxu1 %v2150_v51  ;;  %v2153_v58 = vmax.f32 %v2055_v15, 0.0 }
 0x603   : > { %v3632_v56 = vpop.f32.mrf.mxu0  ;;  %3705 = vmatmul.mubr.f32.gmra.mxu1 %v2151_v52 }
 0x604   : > { %v2152_v57 = vmax.f32 %v2050_v55, 0.0  ;;  %v2065_v59 = vadd.f32 %v3632_v56, %v4499_v10 }
 0x605   : > { %v2059_v60 = vpop.f32.mrf.mxu0 }
 0x606   : > { %v2060_v61 = vadd.f32 %v4499_v10, %v2059_v60  ;;  %3707 = vmatprep.mubr.f32.mxu1 %v2152_v57  ;;  %v2155_v1 = vmax.f32 %v2065_v59, 0.0 }
 0x607   : > { %v3635_v62 = vpop.f32.mrf.mxu0  ;;  %3708 = vmatmul.mubr.f32.gmra.mxu1 %v2153_v58 }
 0x608   : > { %v2154_v63 = vmax.f32 %v2060_v61, 0.0  ;;  %v2075_v2 = vadd.f32 %v3635_v62, %v4499_v10 }
 0x609   : > { %v2069_v3 = vpop.f32.mrf.mxu0 }
 0x60a   : > { %v2070_v4 = vadd.f32 %v4499_v10, %v2069_v3  ;;  %3710 = vmatprep.mubr.f32.mxu1 %v2154_v63  ;;  %v2157_v7 = vmax.f32 %v2075_v2, 0.0 }
 0x60b   : > { %v3638_v5 = vpop.f32.mrf.mxu0  ;;  %3711 = vmatmul.mubr.f32.gmra.mxu1 %v2155_v1 }
 0x60c   : > { %v2156_v6 = vmax.f32 %v2070_v4, 0.0  ;;  %v2085_v8 = vadd.f32 %v3638_v5, %v4499_v10 }
 0x60d   : > { %v2079_v9 = vpop.f32.mrf.mxu0 }
 0x60e   : > { %v2080_v11 = vadd.f32 %v4499_v10, %v2079_v9  ;;  %3713 = vmatprep.mubr.f32.mxu1 %v2156_v6  ;;  %v2159_v14 = vmax.f32 %v2085_v8, 0.0 }
 0x60f   : > { %v3641_v12 = vpop.f32.mrf.mxu0  ;;  %3714 = vmatmul.mubr.f32.gmra.mxu1 %v2157_v7 }
 0x610   : > { %v2158_v13 = vmax.f32 %v2080_v11, 0.0  ;;  %v2095_v16 = vadd.f32 %v3641_v12, %v4499_v10 }
 0x611   : > { %v2089_v17 = vpop.f32.mrf.mxu0 }
 0x612   : > { %v2090_v39 = vadd.f32 %v4499_v10, %v2089_v17  ;;  %3716 = vmatprep.mubr.f32.mxu1 %v2158_v13  ;;  %v2161_v20 = vmax.f32 %v2095_v16, 0.0 }
 0x613   : > { %v3644_v18 = vpop.f32.mrf.mxu0  ;;  %3717 = vmatmul.mubr.f32.gmra.mxu1 %v2159_v14 }
 0x614   : > { %v2160_v19 = vmax.f32 %v2090_v39, 0.0  ;;  %v2105_v21 = vadd.f32 %v3644_v18, %v4499_v10 }
 0x615   : > { %v2099_v22 = vpop.f32.mrf.mxu0 }
 0x616   : > { %v2100_v23 = vadd.f32 %v4499_v10, %v2099_v22  ;;  %3719 = vmatprep.mubr.f32.mxu1 %v2160_v19  ;;  %v2163_v50 = vmax.f32 %v2105_v21, 0.0 }
 0x617   : > { %v3647_v24 = vpop.f32.mrf.mxu0  ;;  %3720 = vmatmul.mubr.f32.gmra.mxu1 %v2161_v20 }
 0x618   : > { %v2162_v25 = vmax.f32 %v2100_v23, 0.0  ;;  %v2115_v26 = vadd.f32 %v3647_v24, %v4499_v10 }
 0x619   : > { %v2109_v27 = vpop.f32.mrf.mxu0 }
 0x61a   : > { %v2110_v53 = vadd.f32 %v4499_v10, %v2109_v27  ;;  %3722 = vmatprep.mubr.f32.mxu1 %v2162_v25  ;;  %v2165_v30 = vmax.f32 %v2115_v26, 0.0 }
 0x61b   : > { %v3650_v28 = vpop.f32.mrf.mxu0  ;;  %3723 = vmatmul.mubr.f32.gmra.mxu1 %v2163_v50 }
 0x61c   : > { %v2164_v29 = vmax.f32 %v2110_v53, 0.0  ;;  %v2125_v31 = vadd.f32 %v3650_v28, %v4499_v10 }
 0x61d   : > { %v2119_v32 = vpop.f32.mrf.mxu0 }
 0x61e   : > { %v2120_v33 = vadd.f32 %v4499_v10, %v2119_v32  ;;  %3725 = vmatprep.mubr.f32.mxu1 %v2164_v29  ;;  %v2167_v37 = vmax.f32 %v2125_v31, 0.0 }
 0x61f   : > { %v3653_v34 = vpop.f32.mrf.mxu0  ;;  %3726 = vmatmul.mubr.f32.gmra.mxu1 %v2165_v30 }
 0x620   : > { %v2166_v35 = vmax.f32 %v2120_v33, 0.0  ;;  %v2135_v38 = vadd.f32 %v3653_v34, %v4499_v10 }
 0x621   : > { %v2129_v0 = vpop.f32.mrf.mxu0 }
 0x622   : > { %v2130_v40 = vadd.f32 %v4499_v10, %v2129_v0  ;;  %3728 = vmatprep.mubr.f32.mxu1 %v2166_v35  ;;  %v2169_v42 = vmax.f32 %v2135_v38, 0.0 }
 0x623   : > { %3729 = vmatmul.mubr.f32.gmra.mxu1 %v2167_v37 }
 0x624   : > { %v2168_v41 = vmax.f32 %v2130_v40, 0.0 }
 0x626   : > { %3731 = vmatprep.mubr.f32.mxu1 %v2168_v41 }
 0x627   : > { %3732 = vmatmul.mubr.f32.gmra.mxu1 %v2169_v42 }
 0x6ab   : > { %v3688_v43 = vpop.f32.mrf.mxu1 }
 0x6ac   : > { %v2264_v44 = vadd.f32 %v3688_v43, %v4533_v36 }
 0x6ad   : > { %v2258_v45 = vpop.f32.mrf.mxu1 }
 0x6ae   : > { %2418 = vst [vmem:[%s4169_s20 + $0x28] sm:$0xff] %v2264_v44  ;;  %v2259_v46 = vadd.f32 %v4533_v36, %v2258_v45 }
 0x6af   : > { %v3691_v10 = vpop.f32.mrf.mxu1 }
 0x6b0   : > { %2417 = vst [vmem:[%s4169_s20] sm:$0xff] %v2259_v46  ;;  %v2274_v47 = vadd.f32 %v3691_v10, %v4533_v36 }
 0x6b1   : > { %v2268_v48 = vpop.f32.mrf.mxu1 }
 0x6b2   : > { %2420 = vst [vmem:[%s4169_s20 + $0x78] sm:$0xff] %v2274_v47  ;;  %v2269_v49 = vadd.f32 %v4533_v36, %v2268_v48 }
 0x6b3   : > { %v3694_v51 = vpop.f32.mrf.mxu1 }
 0x6b4   : > { %2419 = vst [vmem:[%s4169_s20 + $0x50] sm:$0xff] %v2269_v49  ;;  %v2284_v52 = vadd.f32 %v3694_v51, %v4533_v36 }
 0x6b5   : > { %v2278_v15 = vpop.f32.mrf.mxu1 }
 0x6b6   : > { %2422 = vst [vmem:[%s4169_s20 + $0xc8] sm:$0xff] %v2284_v52  ;;  %v2279_v54 = vadd.f32 %v4533_v36, %v2278_v15 }
 0x6b7   : > { %v3697_v55 = vpop.f32.mrf.mxu1 }
 0x6b8   : > { %2421 = vst [vmem:[%s4169_s20 + $0xa0] sm:$0xff] %v2279_v54  ;;  %v2294_v56 = vadd.f32 %v3697_v55, %v4533_v36 }
 0x6b9   : > { %v2288_v57 = vpop.f32.mrf.mxu1 }
 0x6ba   : > { %2424 = vst [vmem:[%s4169_s20 + $0x118] sm:$0xff] %v2294_v56  ;;  %v2289_v58 = vadd.f32 %v4533_v36, %v2288_v57 }
 0x6bb   : > { %v3700_v59 = vpop.f32.mrf.mxu1 }
 0x6bc   : > { %2423 = vst [vmem:[%s4169_s20 + $0xf0] sm:$0xff] %v2289_v58  ;;  %v2304_v60 = vadd.f32 %v3700_v59, %v4533_v36 }
 0x6bd   : > { %v2298_v61 = vpop.f32.mrf.mxu1 }
 0x6be   : > { %2426 = vst [vmem:[%s4169_s20 + $0x168] sm:$0xff] %v2304_v60  ;;  %v2299_v62 = vadd.f32 %v4533_v36, %v2298_v61 }
 0x6bf   : > { %v3703_v63 = vpop.f32.mrf.mxu1 }
 0x6c0   : > { %2425 = vst [vmem:[%s4169_s20 + $0x140] sm:$0xff] %v2299_v62  ;;  %v2314_v1 = vadd.f32 %v3703_v63, %v4533_v36 }
 0x6c1   : > { %v2308_v2 = vpop.f32.mrf.mxu1 }
 0x6c2   : > { %2428 = vst [vmem:[%s4169_s20 + $0x1b8] sm:$0xff] %v2314_v1  ;;  %v2309_v3 = vadd.f32 %v4533_v36, %v2308_v2 }
 0x6c3   : > { %v3706_v4 = vpop.f32.mrf.mxu1 }
 0x6c4   : > { %2427 = vst [vmem:[%s4169_s20 + $0x190] sm:$0xff] %v2309_v3  ;;  %v2324_v5 = vadd.f32 %v3706_v4, %v4533_v36 }
 0x6c5   : > { %v2318_v6 = vpop.f32.mrf.mxu1 }
 0x6c6   : > { %2430 = vst [vmem:[%s4169_s20 + $0x208] sm:$0xff] %v2324_v5  ;;  %v2319_v7 = vadd.f32 %v4533_v36, %v2318_v6 }
 0x6c7   : > { %v3709_v8 = vpop.f32.mrf.mxu1 }
 0x6c8   : > { %2429 = vst [vmem:[%s4169_s20 + $0x1e0] sm:$0xff] %v2319_v7  ;;  %v2334_v9 = vadd.f32 %v3709_v8, %v4533_v36 }
 0x6c9   : > { %v2328_v11 = vpop.f32.mrf.mxu1 }
 0x6ca   : > { %2432 = vst [vmem:[%s4169_s20 + $0x258] sm:$0xff] %v2334_v9  ;;  %v2329_v12 = vadd.f32 %v4533_v36, %v2328_v11 }
 0x6cb   : > { %v3712_v13 = vpop.f32.mrf.mxu1 }
 0x6cc   : > { %2431 = vst [vmem:[%s4169_s20 + $0x230] sm:$0xff] %v2329_v12  ;;  %v2344_v14 = vadd.f32 %v3712_v13, %v4533_v36 }
 0x6cd   : > { %v2338_v16 = vpop.f32.mrf.mxu1 }
 0x6ce   : > { %2434 = vst [vmem:[%s4169_s20 + $0x2a8] sm:$0xff] %v2344_v14  ;;  %v2339_v17 = vadd.f32 %v4533_v36, %v2338_v16 }
 0x6cf   : > { %v3715_v39 = vpop.f32.mrf.mxu1 }
 0x6d0   : > { %2433 = vst [vmem:[%s4169_s20 + $0x280] sm:$0xff] %v2339_v17  ;;  %v2354_v18 = vadd.f32 %v3715_v39, %v4533_v36 }
 0x6d1   : > { %v2348_v19 = vpop.f32.mrf.mxu1 }
 0x6d2   : > { %2436 = vst [vmem:[%s4169_s20 + $0x2f8] sm:$0xff] %v2354_v18  ;;  %v2349_v20 = vadd.f32 %v4533_v36, %v2348_v19 }
 0x6d3   : > { %v3718_v21 = vpop.f32.mrf.mxu1 }
 0x6d4   : > { %2435 = vst [vmem:[%s4169_s20 + $0x2d0] sm:$0xff] %v2349_v20  ;;  %v2364_v22 = vadd.f32 %v3718_v21, %v4533_v36 }
 0x6d5   : > { %v2358_v23 = vpop.f32.mrf.mxu1 }
 0x6d6   : > { %2438 = vst [vmem:[%s4169_s20 + $0x348] sm:$0xff] %v2364_v22  ;;  %v2359_v24 = vadd.f32 %v4533_v36, %v2358_v23 }
 0x6d7   : > { %v3721_v25 = vpop.f32.mrf.mxu1 }
 0x6d8   : > { %2437 = vst [vmem:[%s4169_s20 + $0x320] sm:$0xff] %v2359_v24  ;;  %v2374_v50 = vadd.f32 %v3721_v25, %v4533_v36 }
 0x6d9   : > { %v2368_v26 = vpop.f32.mrf.mxu1 }
 0x6da   : > { %2440 = vst [vmem:[%s4169_s20 + $0x398] sm:$0xff] %v2374_v50  ;;  %v2369_v27 = vadd.f32 %v4533_v36, %v2368_v26 }
 0x6db   : > { %v3724_v53 = vpop.f32.mrf.mxu1 }
 0x6dc   : > { %2439 = vst [vmem:[%s4169_s20 + $0x370] sm:$0xff] %v2369_v27  ;;  %v2384_v28 = vadd.f32 %v3724_v53, %v4533_v36 }
 0x6dd   : > { %v2378_v29 = vpop.f32.mrf.mxu1 }
 0x6de   : > { %2442 = vst [vmem:[%s4169_s20 + $0x3e8] sm:$0xff] %v2384_v28  ;;  %v2379_v30 = vadd.f32 %v4533_v36, %v2378_v29 }
 0x6df   : > { %v3727_v31 = vpop.f32.mrf.mxu1 }
 0x6e0   : > { %2441 = vst [vmem:[%s4169_s20 + $0x3c0] sm:$0xff] %v2379_v30  ;;  %v2394_v32 = vadd.f32 %v3727_v31, %v4533_v36 }
 0x6e1   : > { %v2388_v33 = vpop.f32.mrf.mxu1 }
 0x6e2   : > { %2444 = vst [vmem:[%s4169_s20 + $0x438] sm:$0xff] %v2394_v32  ;;  %v2389_v34 = vadd.f32 %v4533_v36, %v2388_v33 }
 0x6e3   : > { %v3730_v35 = vpop.f32.mrf.mxu1 }
 0x6e4   : > { %2443 = vst [vmem:[%s4169_s20 + $0x410] sm:$0xff] %v2389_v34  ;;  %v2404_v37 = vadd.f32 %v3730_v35, %v4533_v36 }
 0x6e5   : > { %v2398_v38 = vpop.f32.mrf.mxu1 }
 0x6e6   : > { %2446 = vst [vmem:[%s4169_s20 + $0x488] sm:$0xff] %v2404_v37  ;;  %v2399_v0 = vadd.f32 %v4533_v36, %v2398_v38 }
 0x6e7   : > { %v3733_v40 = vpop.f32.mrf.mxu1 }
 0x6e8   : > { %2445 = vst [vmem:[%s4169_s20 + $0x460] sm:$0xff] %v2399_v0  ;;  %v2414_v41 = vadd.f32 %v3733_v40, %v4533_v36 }
 0x6e9   : > { %v2408_v42 = vpop.f32.mrf.mxu1 }
 0x6ea   : > { %2448 = vst [vmem:[%s4169_s20 + $0x4d8] sm:$0xff] %v2414_v41  ;;  %v2409_v43 = vadd.f32 %v4533_v36, %v2408_v42 }
 0x6ec   : > { %2447 = vst [vmem:[%s4169_s20 + $0x4b0] sm:$0xff] %v2409_v43 }
 0x6ed   : > { %3900 = shalt.err (!%p3897_p3)
}
 0x6ee   : > { %s3901_s23 = scalar_lea.hbm %s4601_s30, 20480  ;;  %s3905_s6 = scalar_lea.hbm %s4652_s3, 40960 }
 0x6ef   : > { %p3902_p11 = scmp.ne.s32.totalorder %s4601_s30, %s3901_s23  ;;  %p3906_p4 = scmp.lt.s32.totalorder %s4601_s30, %s4652_s3 }
 0x6f0   : > { %p3907_p6 = scmp.lt.s32.totalorder %s3905_s6, %s3901_s23 }
 0x6f1   : > { %p3903_p9 = pnand %p3902_p11, %p4667_p2 }
 0x6f2   : > { %p3908_p8 = por %p3907_p6, %p3906_p4 }
 0x6f3   : > { %p3904_p1 = pneg %p3903_p9 }
 0x6f5   : > { %p3909_p5 = pnand %p3908_p8, %p3904_p1 }
 0x6f7   : > { %3912 = shalt.err (!%p3909_p5)
}
 0x6f8   : > { %s3963_s18 = smov 640   ;;  %s3964_s20 = smov 40  }
 0x6f9   : > { %3746 = dma.vmem_to_hbm [thread:$0]  (%p4667_p2), %s4603_s28, 20480, %s4601_s30, %s2578_s16, %s3963_s18, %s3963_s18, %s3964_s20  }
 0x6fa PF: > { %s2607_s27 = sand.u32 1, %s3943_s12   ;;  %p4668_p7 = scmp.ne.s32.totalorder %s4658_s19, 0 }
 0x6fb   : > { %p4669_p12 = scmp.ge.s32.totalorder %s3955_s15, 2  ;;  %s2608_s25 = scalar_lea.sflag [#allocation4], %s2607_s27 }
 0x6fd   : > { %p3760_p13 = pnand %p4669_p12, %p4668_p7 }
 0x6ff   : > { %p3761_p0 = pneg %p3760_p13 }
 0x701   : > { %3938 = dma.done.wait (%p3761_p0), %s2608_s25, 20480  }
 0x702   : > { %3940 = vsyncadd (%p3761_p0), %s2608_s25, 4294946816  ;;  %p17_p10 = scmp.ge.s32.totalorder %s4060_s7, 4   ;;  %s4670_s12 = smov %s3947_s13 }
 0x703   : > { %s4671_s13 = smov %s3951_s14  ;;  %s4672_s14 = smov %s4076_s11 }
 0x704   : > { %s4673_s15 = smov %s4060_s7  ;;  %19 = sbr.rel (!%p17_p10) target bundleno = 6 (0x6), region = 92 }
 0x709   :  { %2613 = vsyncpa [#allocation3], 1 }
 0x70a   :  { %2615 = vsyncpa [#allocation3 + $0x1], 1 }
 0x70b   :  { %2616 = vsyncpa [#allocation6], 1 }
 0x70c   :  { %2617 = vsyncpa [#allocation4], 1 }
 0x70d   :  { %2619 = vsyncpa [#allocation4 + $0x1], 1 }

</bundles_post_ra>
